<compile_context>
chip_gen: v6e
topology: v6e:2x2x1
jax: 0.10.0
libtpu: 0.0.40
codegen_flags: <defaults>
</compile_context>

<pallas_src>
import math
import functools

import jax
import jax.numpy as jnp
from jax.experimental import pallas as pl
from jax.experimental.pallas import tpu as pltpu


def _mha_kernel(q_ref, h_ref, wproj_ref, wo_ref, o_ref, *,
                n_heads, key_dim, val_dim, mxu_dtype):
    # q_ref: (Bb, Nq, D), h_ref: (Bb, G, D)
    # wproj_ref: (D, 2*H*Kd + H*Vd) = [norm*Wq | Wk | Wv], wo_ref: (H*Vd, E)
    # o_ref: (Bb, Nq, E)
    H, Kd, Vd = n_heads, key_dim, val_dim
    Bb, Nq, D = q_ref.shape
    G = h_ref.shape[1]
    E = o_ref.shape[-1]
    f32 = jnp.float32
    cdt = f32 if mxu_dtype is None else mxu_dtype
    HKd, HVd = H * Kd, H * Vd

    # --- ONE fused projection matmul for Q, K and V -------------------------
    # Row-stack q and h; the q rows only use the first H*Kd columns, the h rows
    # only the remaining columns (the "wasted" cross terms land in lanes that
    # were padding anyway at D=16 contraction depth).
    q2 = q_ref[...].astype(cdt).reshape(Bb * Nq, D)
    h2 = h_ref[...].astype(cdt).reshape(Bb * G, D)
    x = jnp.concatenate([q2, h2], axis=0)                     # (Bb*(Nq+G), D)
    proj = jnp.dot(x, wproj_ref[...].astype(cdt),
                   preferred_element_type=f32)                # (Bb*(Nq+G), 2HKd+HVd)

    # Split rows/cols, then split the head axis by reshape (no per-head 8-lane
    # slices in the hot loop). norm_factor is already folded into the Wq slab.
    q_all = proj[:Bb * Nq, :HKd].reshape(Bb, Nq, H, Kd)
    k_all = proj[Bb * Nq:, HKd:2 * HKd].reshape(Bb, G, H, Kd)
    v_all = proj[Bb * Nq:, 2 * HKd:].reshape(Bb, G, H, Vd)

    heads = []
    for head in range(H):  # H is small and static -> unrolled
        qh = q_all[:, :, head, :]                             # (Bb, Nq, Kd)
        kh = k_all[:, :, head, :]                             # (Bb, G, Kd)
        vh = v_all[:, :, head, :]                             # (Bb, G, Vd)

        # Batched QK^T contracting the feature axes directly (no explicit K.T).
        compat = jnp.einsum('bnk,bgk->bng', qh.astype(cdt), kh.astype(cdt),
                            preferred_element_type=f32)       # (Bb, Nq, G)

        # Numerically stable softmax (f32); normalization deferred past attn@V.
        m = jnp.max(compat, axis=-1, keepdims=True)
        p = jnp.exp(compat - m)
        denom = jnp.sum(p, axis=-1, keepdims=True)            # (Bb, Nq, 1)

        hv = jnp.einsum('bng,bgv->bnv', p.astype(cdt), vh.astype(cdt),
                        preferred_element_type=f32)           # (Bb, Nq, Vd)

        # EUP reciprocal (free slot) + one Newton step to recover f32 accuracy.
        inv = pl.reciprocal(denom, approx=True)
        inv = inv * (2.0 - denom * inv)
        heads.append(hv * inv)

    # Head-major concat == PyTorch's permute(1,2,0,3).view(-1, H*Vd); a single
    # matmul against W_out.view(H*Vd, E) produces the output.
    heads_cat = jnp.concatenate(heads, axis=-1).reshape(Bb * Nq, HVd)
    out = jnp.dot(heads_cat.astype(cdt), wo_ref[...].astype(cdt),
                  preferred_element_type=f32)                 # (Bb*Nq, E)

    o_ref[...] = out.reshape(Bb, Nq, E).astype(o_ref.dtype)


def multi_head_attention(q, h, W_query, W_key, W_val, W_out, *,
                         norm_factor, mask=None, max_batch_blocks=1,
                         mxu_dtype=None):
    """q: (B, Nq, D), h: (B, G, D); returns (B, Nq, E).

    mask must be None (masked path not implemented).
    mxu_dtype=jnp.bfloat16 casts MXU operands only (softmax stays f32); this is
    a further win on v5e/v6e/v7x whose MXUs are bf16-native, but loosen the
    parity tolerance when enabling it. Default keeps f32 for exact parity with
    the PyTorch module.
    """
    assert mask is None, "TODO(synk): mask path not implemented in Pallas kernel"
    B, Nq, D = q.shape
    _, G, _ = h.shape
    H, _, Kd = W_query.shape
    Vd = W_val.shape[-1]
    E = W_out.shape[-1]

    # --- wrapper-side one-time weight repacking into ONE lane-dense slab ----
    # norm_factor is folded into the Wq columns (constant-foldable for params).
    wq_slab = jnp.transpose(W_query, (1, 0, 2)).reshape(D, H * Kd) * norm_factor
    wk_slab = jnp.transpose(W_key, (1, 0, 2)).reshape(D, H * Kd)
    wv_slab = jnp.transpose(W_val, (1, 0, 2)).reshape(D, H * Vd)
    w_proj = jnp.concatenate([wq_slab, wk_slab, wv_slab], axis=-1)  # (D, 2HKd+HVd)
    wo_flat = W_out.reshape(H * Vd, E)                              # (H*Vd, E)

    # --- batch blocking: default is ONE grid step (overhead-bound regime). ---
    nb = 1
    for cand in range(min(max_batch_blocks, B), 0, -1):
        if B % cand == 0:
            nb = cand
            break
    Bb = B // nb
    P = 2 * H * Kd + H * Vd

    kernel = functools.partial(
        _mha_kernel, n_heads=H, key_dim=Kd, val_dim=Vd, mxu_dtype=mxu_dtype)

    return pl.pallas_call(
        kernel,
        out_shape=jax.ShapeDtypeStruct((B, Nq, E), q.dtype),
        grid_spec=pltpu.PrefetchScalarGridSpec(
            num_scalar_prefetch=0,
            grid=(nb,),
            in_specs=[
                pl.BlockSpec((Bb, Nq, D), lambda b: (b, 0, 0)),   # q batch block
                pl.BlockSpec((Bb, G, D), lambda b: (b, 0, 0)),    # h batch block
                # Constant-index weight slabs: DMA issued once, reused each step.
                pl.BlockSpec((D, P), lambda b: (0, 0)),           # [norm*Wq|Wk|Wv]
                pl.BlockSpec((H * Vd, E), lambda b: (0, 0)),      # W_out (flat)
            ],
            out_specs=pl.BlockSpec((Bb, Nq, E), lambda b: (b, 0, 0)),
        ),
        compiler_params=pltpu.CompilerParams(
            # Only relevant when nb>1 (e.g. sharding fat blocks across v7x TCs).
            dimension_semantics=("parallel",),
        ),
    )(q, h, w_proj, wo_flat)


def _reference_mha(q, h, wq, wk, wv, wo, norm_factor):
    """Pure-JAX reference mirroring the PyTorch forward (mask=None)."""
    B, Nq, D = q.shape
    _, G, _ = h.shape
    H, _, Kd = wq.shape
    E = wo.shape[-1]
    qflat = q.reshape(-1, D)
    hflat = h.reshape(-1, D)
    Q = jnp.matmul(qflat, wq).reshape(H, B, Nq, -1)
    K = jnp.matmul(hflat, wk).reshape(H, B, G, -1)
    V = jnp.matmul(hflat, wv).reshape(H, B, G, -1)
    compat = norm_factor * jnp.matmul(Q, jnp.swapaxes(K, 2, 3))
    attn = jax.nn.softmax(compat, axis=-1)
    heads = jnp.matmul(attn, V)                                   # (H, B, Nq, Vd)
    out = jnp.matmul(
        jnp.transpose(heads, (1, 2, 0, 3)).reshape(B * Nq, -1),
        wo.reshape(-1, E),
    ).reshape(B, Nq, E)
    return out


if __name__ == "__main__":
    # Module hyperparameters
    n_heads = 4
    input_dim = 16
    embed_dim = 32
    val_dim = embed_dim // n_heads   # 8
    key_dim = val_dim                # 8
    norm_factor = 1.0 / math.sqrt(key_dim)

    # Small input shapes
    batch_size = 2
    n_query = 8
    graph_size = 8

    key = jax.random.PRNGKey(0)
    k_q, k_h, k_wq, k_wk, k_wv, k_wo = jax.random.split(key, 6)

    # Deterministic parameter init mimicking uniform(-stdv, stdv), stdv = 1/sqrt(last_dim)
    def init_param(k, shape):
        stdv = 1.0 / math.sqrt(shape[-1])
        return jax.random.uniform(k, shape, jnp.float32, minval=-stdv, maxval=stdv)

    W_query = init_param(k_wq, (n_heads, input_dim, key_dim))
    W_key = init_param(k_wk, (n_heads, input_dim, key_dim))
    W_val = init_param(k_wv, (n_heads, input_dim, val_dim))
    W_out = init_param(k_wo, (n_heads, val_dim, embed_dim))

    q = jax.random.normal(k_q, (batch_size, n_query, input_dim), jnp.float32)
    h = jax.random.normal(k_h, (batch_size, graph_size, input_dim), jnp.float32)

    out = multi_head_attention(q, h, W_query, W_key, W_val, W_out,
                               norm_factor=norm_factor)
    out = jax.block_until_ready(out)

    ref = _reference_mha(q, h, W_query, W_key, W_val, W_out, norm_factor)
    ref = jax.block_until_ready(ref)

    assert out.shape == (batch_size, n_query, embed_dim)
    assert jnp.allclose(out, ref, atol=1e-4, rtol=1e-4), "mismatch vs reference"

    print("KERNEL_OK")
</pallas_src>

<mosaic_0001>
module attributes {stable_mosaic.version = 11 : i64} {
  func.func @_mha_kernel(%arg0: i32, %arg1: memref<2x8x16xf32, #tpu.memory_space<vmem>>, %arg2: memref<2x8x16xf32, #tpu.memory_space<vmem>>, %arg3: memref<16x96xf32, #tpu.memory_space<vmem>>, %arg4: memref<32x32xf32, #tpu.memory_space<vmem>>, %arg5: memref<2x8x32xf32, #tpu.memory_space<vmem>>) attributes {dimension_semantics = [#tpu.dimension_semantics<parallel>], iteration_bounds = array<i64: 1>, scalar_prefetch = 0 : i64, scratch_operands = 0 : i64, tpu.core_type = #tpu.core_type<tc>, window_params = [{transform_indices = @transform_0, window_bounds = array<i64: 2, 8, 16>}, {transform_indices = @transform_1, window_bounds = array<i64: 2, 8, 16>}, {pipeline_mode = #tpu.pipeline_mode<synchronous>, transform_indices = @transform_2, window_bounds = array<i64: 16, 96>}, {pipeline_mode = #tpu.pipeline_mode<synchronous>, transform_indices = @transform_3, window_bounds = array<i64: 32, 32>}, {transform_indices = @transform_4, window_bounds = array<i64: 2, 8, 32>}]} {
    %c0 = arith.constant 0 : index
    %c0_0 = arith.constant 0 : index
    %c0_1 = arith.constant 0 : index
    %0 = vector.load %arg1[%c0, %c0_0, %c0_1] : memref<2x8x16xf32, #tpu.memory_space<vmem>>, vector<2x8x16xf32>
    %1 = vector.shape_cast %0 : vector<2x8x16xf32> to vector<16x16xf32>
    %c0_2 = arith.constant 0 : index
    %c0_3 = arith.constant 0 : index
    %c0_4 = arith.constant 0 : index
    %2 = vector.load %arg2[%c0_2, %c0_3, %c0_4] : memref<2x8x16xf32, #tpu.memory_space<vmem>>, vector<2x8x16xf32>
    %3 = vector.shape_cast %2 : vector<2x8x16xf32> to vector<16x16xf32>
    %4 = tpu.concatenate %1, %3 in 0 : vector<16x16xf32>, vector<16x16xf32> -> vector<32x16xf32>
    %c0_5 = arith.constant 0 : index
    %c0_6 = arith.constant 0 : index
    %5 = vector.load %arg3[%c0_5, %c0_6] : memref<16x96xf32, #tpu.memory_space<vmem>>, vector<16x96xf32>
    %cst = arith.constant dense<0.000000e+00> : vector<32x96xf32>
    %6 = tpu.matmul %4, %5, %cst {dimension_numbers = #tpu.dot_dimension_numbers<[1], [0], [0], [1], [0, 0, 1, 1], [], []>} : vector<32x16xf32>, vector<16x96xf32>, vector<32x96xf32> -> vector<32x96xf32>
    %7 = vector.extract_strided_slice %6 {offsets = [0, 0], sizes = [16, 32], strides = [1, 1]} : vector<32x96xf32> to vector<16x32xf32>
    %8 = vector.shape_cast %7 : vector<16x32xf32> to vector<2x8x4x8xf32>
    %9 = vector.extract_strided_slice %6 {offsets = [16, 32], sizes = [16, 32], strides = [1, 1]} : vector<32x96xf32> to vector<16x32xf32>
    %10 = vector.shape_cast %9 : vector<16x32xf32> to vector<2x8x4x8xf32>
    %11 = vector.extract_strided_slice %6 {offsets = [16, 64], sizes = [16, 32], strides = [1, 1]} : vector<32x96xf32> to vector<16x32xf32>
    %12 = vector.shape_cast %11 : vector<16x32xf32> to vector<2x8x4x8xf32>
    %13 = vector.extract_strided_slice %8 {offsets = [0, 0, 0, 0], sizes = [2, 8, 1, 8], strides = [1, 1, 1, 1]} : vector<2x8x4x8xf32> to vector<2x8x1x8xf32>
    %14 = vector.shape_cast %13 : vector<2x8x1x8xf32> to vector<2x8x8xf32>
    %15 = vector.extract_strided_slice %10 {offsets = [0, 0, 0, 0], sizes = [2, 8, 1, 8], strides = [1, 1, 1, 1]} : vector<2x8x4x8xf32> to vector<2x8x1x8xf32>
    %16 = vector.shape_cast %15 : vector<2x8x1x8xf32> to vector<2x8x8xf32>
    %17 = vector.extract_strided_slice %12 {offsets = [0, 0, 0, 0], sizes = [2, 8, 1, 8], strides = [1, 1, 1, 1]} : vector<2x8x4x8xf32> to vector<2x8x1x8xf32>
    %18 = vector.shape_cast %17 : vector<2x8x1x8xf32> to vector<2x8x8xf32>
    "tpu.trace_start"() <{level = 10 : i32, message = "bnk,bgk->bng"}> : () -> ()
    %cst_7 = arith.constant dense<0.000000e+00> : vector<2x8x8xf32>
    %19 = tpu.matmul %14, %16, %cst_7 {dimension_numbers = #tpu.dot_dimension_numbers<[2], [2], [1], [1], [0, 0, 0, 1, 1, 1], [0], [0]>} : vector<2x8x8xf32>, vector<2x8x8xf32>, vector<2x8x8xf32> -> vector<2x8x8xf32>
    "tpu.trace_stop"() : () -> ()
    %cst_8 = arith.constant dense<0xFF800000> : vector<2x8xf32>
    %20 = vector.multi_reduction <maximumf>, %19, %cst_8 [2] : vector<2x8x8xf32> to vector<2x8xf32>
    %21 = vector.shape_cast %20 : vector<2x8xf32> to vector<2x8x1xf32>
    %22 = vector.broadcast %21 : vector<2x8x1xf32> to vector<2x8x8xf32>
    %23 = arith.subf %19, %22 : vector<2x8x8xf32>
    %24 = math.exp %23 : vector<2x8x8xf32>
    %cst_9 = arith.constant dense<0.000000e+00> : vector<2x8xf32>
    %25 = vector.multi_reduction <add>, %24, %cst_9 [2] : vector<2x8x8xf32> to vector<2x8xf32>
    %26 = vector.shape_cast %25 : vector<2x8xf32> to vector<2x8x1xf32>
    "tpu.trace_start"() <{level = 10 : i32, message = "bng,bgv->bnv"}> : () -> ()
    %cst_10 = arith.constant dense<0.000000e+00> : vector<2x8x8xf32>
    %27 = tpu.matmul %24, %18, %cst_10 {dimension_numbers = #tpu.dot_dimension_numbers<[2], [1], [1], [2], [0, 0, 0, 1, 1, 2], [0], [0]>} : vector<2x8x8xf32>, vector<2x8x8xf32>, vector<2x8x8xf32> -> vector<2x8x8xf32>
    "tpu.trace_stop"() : () -> ()
    %28 = tpu.reciprocal %26 {approx = true} : vector<2x8x1xf32> -> vector<2x8x1xf32>
    %29 = arith.mulf %26, %28 : vector<2x8x1xf32>
    %cst_11 = arith.constant 2.000000e+00 : f32
    %30 = vector.broadcast %cst_11 : f32 to vector<2x8x1xf32>
    %31 = arith.subf %30, %29 : vector<2x8x1xf32>
    %32 = arith.mulf %28, %31 : vector<2x8x1xf32>
    %33 = vector.broadcast %32 : vector<2x8x1xf32> to vector<2x8x8xf32>
    %34 = arith.mulf %27, %33 : vector<2x8x8xf32>
    %35 = vector.extract_strided_slice %8 {offsets = [0, 0, 1, 0], sizes = [2, 8, 1, 8], strides = [1, 1, 1, 1]} : vector<2x8x4x8xf32> to vector<2x8x1x8xf32>
    %36 = vector.shape_cast %35 : vector<2x8x1x8xf32> to vector<2x8x8xf32>
    %37 = vector.extract_strided_slice %10 {offsets = [0, 0, 1, 0], sizes = [2, 8, 1, 8], strides = [1, 1, 1, 1]} : vector<2x8x4x8xf32> to vector<2x8x1x8xf32>
    %38 = vector.shape_cast %37 : vector<2x8x1x8xf32> to vector<2x8x8xf32>
    %39 = vector.extract_strided_slice %12 {offsets = [0, 0, 1, 0], sizes = [2, 8, 1, 8], strides = [1, 1, 1, 1]} : vector<2x8x4x8xf32> to vector<2x8x1x8xf32>
    %40 = vector.shape_cast %39 : vector<2x8x1x8xf32> to vector<2x8x8xf32>
    "tpu.trace_start"() <{level = 10 : i32, message = "bnk,bgk->bng"}> : () -> ()
    %cst_12 = arith.constant dense<0.000000e+00> : vector<2x8x8xf32>
    %41 = tpu.matmul %36, %38, %cst_12 {dimension_numbers = #tpu.dot_dimension_numbers<[2], [2], [1], [1], [0, 0, 0, 1, 1, 1], [0], [0]>} : vector<2x8x8xf32>, vector<2x8x8xf32>, vector<2x8x8xf32> -> vector<2x8x8xf32>
    "tpu.trace_stop"() : () -> ()
    %cst_13 = arith.constant dense<0xFF800000> : vector<2x8xf32>
    %42 = vector.multi_reduction <maximumf>, %41, %cst_13 [2] : vector<2x8x8xf32> to vector<2x8xf32>
    %43 = vector.shape_cast %42 : vector<2x8xf32> to vector<2x8x1xf32>
    %44 = vector.broadcast %43 : vector<2x8x1xf32> to vector<2x8x8xf32>
    %45 = arith.subf %41, %44 : vector<2x8x8xf32>
    %46 = math.exp %45 : vector<2x8x8xf32>
    %cst_14 = arith.constant dense<0.000000e+00> : vector<2x8xf32>
    %47 = vector.multi_reduction <add>, %46, %cst_14 [2] : vector<2x8x8xf32> to vector<2x8xf32>
    %48 = vector.shape_cast %47 : vector<2x8xf32> to vector<2x8x1xf32>
    "tpu.trace_start"() <{level = 10 : i32, message = "bng,bgv->bnv"}> : () -> ()
    %cst_15 = arith.constant dense<0.000000e+00> : vector<2x8x8xf32>
    %49 = tpu.matmul %46, %40, %cst_15 {dimension_numbers = #tpu.dot_dimension_numbers<[2], [1], [1], [2], [0, 0, 0, 1, 1, 2], [0], [0]>} : vector<2x8x8xf32>, vector<2x8x8xf32>, vector<2x8x8xf32> -> vector<2x8x8xf32>
    "tpu.trace_stop"() : () -> ()
    %50 = tpu.reciprocal %48 {approx = true} : vector<2x8x1xf32> -> vector<2x8x1xf32>
    %51 = arith.mulf %48, %50 : vector<2x8x1xf32>
    %cst_16 = arith.constant 2.000000e+00 : f32
    %52 = vector.broadcast %cst_16 : f32 to vector<2x8x1xf32>
    %53 = arith.subf %52, %51 : vector<2x8x1xf32>
    %54 = arith.mulf %50, %53 : vector<2x8x1xf32>
    %55 = vector.broadcast %54 : vector<2x8x1xf32> to vector<2x8x8xf32>
    %56 = arith.mulf %49, %55 : vector<2x8x8xf32>
    %57 = vector.extract_strided_slice %8 {offsets = [0, 0, 2, 0], sizes = [2, 8, 1, 8], strides = [1, 1, 1, 1]} : vector<2x8x4x8xf32> to vector<2x8x1x8xf32>
    %58 = vector.shape_cast %57 : vector<2x8x1x8xf32> to vector<2x8x8xf32>
    %59 = vector.extract_strided_slice %10 {offsets = [0, 0, 2, 0], sizes = [2, 8, 1, 8], strides = [1, 1, 1, 1]} : vector<2x8x4x8xf32> to vector<2x8x1x8xf32>
    %60 = vector.shape_cast %59 : vector<2x8x1x8xf32> to vector<2x8x8xf32>
    %61 = vector.extract_strided_slice %12 {offsets = [0, 0, 2, 0], sizes = [2, 8, 1, 8], strides = [1, 1, 1, 1]} : vector<2x8x4x8xf32> to vector<2x8x1x8xf32>
    %62 = vector.shape_cast %61 : vector<2x8x1x8xf32> to vector<2x8x8xf32>
    "tpu.trace_start"() <{level = 10 : i32, message = "bnk,bgk->bng"}> : () -> ()
    %cst_17 = arith.constant dense<0.000000e+00> : vector<2x8x8xf32>
    %63 = tpu.matmul %58, %60, %cst_17 {dimension_numbers = #tpu.dot_dimension_numbers<[2], [2], [1], [1], [0, 0, 0, 1, 1, 1], [0], [0]>} : vector<2x8x8xf32>, vector<2x8x8xf32>, vector<2x8x8xf32> -> vector<2x8x8xf32>
    "tpu.trace_stop"() : () -> ()
    %cst_18 = arith.constant dense<0xFF800000> : vector<2x8xf32>
    %64 = vector.multi_reduction <maximumf>, %63, %cst_18 [2] : vector<2x8x8xf32> to vector<2x8xf32>
    %65 = vector.shape_cast %64 : vector<2x8xf32> to vector<2x8x1xf32>
    %66 = vector.broadcast %65 : vector<2x8x1xf32> to vector<2x8x8xf32>
    %67 = arith.subf %63, %66 : vector<2x8x8xf32>
    %68 = math.exp %67 : vector<2x8x8xf32>
    %cst_19 = arith.constant dense<0.000000e+00> : vector<2x8xf32>
    %69 = vector.multi_reduction <add>, %68, %cst_19 [2] : vector<2x8x8xf32> to vector<2x8xf32>
    %70 = vector.shape_cast %69 : vector<2x8xf32> to vector<2x8x1xf32>
    "tpu.trace_start"() <{level = 10 : i32, message = "bng,bgv->bnv"}> : () -> ()
    %cst_20 = arith.constant dense<0.000000e+00> : vector<2x8x8xf32>
    %71 = tpu.matmul %68, %62, %cst_20 {dimension_numbers = #tpu.dot_dimension_numbers<[2], [1], [1], [2], [0, 0, 0, 1, 1, 2], [0], [0]>} : vector<2x8x8xf32>, vector<2x8x8xf32>, vector<2x8x8xf32> -> vector<2x8x8xf32>
    "tpu.trace_stop"() : () -> ()
    %72 = tpu.reciprocal %70 {approx = true} : vector<2x8x1xf32> -> vector<2x8x1xf32>
    %73 = arith.mulf %70, %72 : vector<2x8x1xf32>
    %cst_21 = arith.constant 2.000000e+00 : f32
    %74 = vector.broadcast %cst_21 : f32 to vector<2x8x1xf32>
    %75 = arith.subf %74, %73 : vector<2x8x1xf32>
    %76 = arith.mulf %72, %75 : vector<2x8x1xf32>
    %77 = vector.broadcast %76 : vector<2x8x1xf32> to vector<2x8x8xf32>
    %78 = arith.mulf %71, %77 : vector<2x8x8xf32>
    %79 = vector.extract_strided_slice %8 {offsets = [0, 0, 3, 0], sizes = [2, 8, 1, 8], strides = [1, 1, 1, 1]} : vector<2x8x4x8xf32> to vector<2x8x1x8xf32>
    %80 = vector.shape_cast %79 : vector<2x8x1x8xf32> to vector<2x8x8xf32>
    %81 = vector.extract_strided_slice %10 {offsets = [0, 0, 3, 0], sizes = [2, 8, 1, 8], strides = [1, 1, 1, 1]} : vector<2x8x4x8xf32> to vector<2x8x1x8xf32>
    %82 = vector.shape_cast %81 : vector<2x8x1x8xf32> to vector<2x8x8xf32>
    %83 = vector.extract_strided_slice %12 {offsets = [0, 0, 3, 0], sizes = [2, 8, 1, 8], strides = [1, 1, 1, 1]} : vector<2x8x4x8xf32> to vector<2x8x1x8xf32>
    %84 = vector.shape_cast %83 : vector<2x8x1x8xf32> to vector<2x8x8xf32>
    "tpu.trace_start"() <{level = 10 : i32, message = "bnk,bgk->bng"}> : () -> ()
    %cst_22 = arith.constant dense<0.000000e+00> : vector<2x8x8xf32>
    %85 = tpu.matmul %80, %82, %cst_22 {dimension_numbers = #tpu.dot_dimension_numbers<[2], [2], [1], [1], [0, 0, 0, 1, 1, 1], [0], [0]>} : vector<2x8x8xf32>, vector<2x8x8xf32>, vector<2x8x8xf32> -> vector<2x8x8xf32>
    "tpu.trace_stop"() : () -> ()
    %cst_23 = arith.constant dense<0xFF800000> : vector<2x8xf32>
    %86 = vector.multi_reduction <maximumf>, %85, %cst_23 [2] : vector<2x8x8xf32> to vector<2x8xf32>
    %87 = vector.shape_cast %86 : vector<2x8xf32> to vector<2x8x1xf32>
    %88 = vector.broadcast %87 : vector<2x8x1xf32> to vector<2x8x8xf32>
    %89 = arith.subf %85, %88 : vector<2x8x8xf32>
    %90 = math.exp %89 : vector<2x8x8xf32>
    %cst_24 = arith.constant dense<0.000000e+00> : vector<2x8xf32>
    %91 = vector.multi_reduction <add>, %90, %cst_24 [2] : vector<2x8x8xf32> to vector<2x8xf32>
    %92 = vector.shape_cast %91 : vector<2x8xf32> to vector<2x8x1xf32>
    "tpu.trace_start"() <{level = 10 : i32, message = "bng,bgv->bnv"}> : () -> ()
    %cst_25 = arith.constant dense<0.000000e+00> : vector<2x8x8xf32>
    %93 = tpu.matmul %90, %84, %cst_25 {dimension_numbers = #tpu.dot_dimension_numbers<[2], [1], [1], [2], [0, 0, 0, 1, 1, 2], [0], [0]>} : vector<2x8x8xf32>, vector<2x8x8xf32>, vector<2x8x8xf32> -> vector<2x8x8xf32>
    "tpu.trace_stop"() : () -> ()
    %94 = tpu.reciprocal %92 {approx = true} : vector<2x8x1xf32> -> vector<2x8x1xf32>
    %95 = arith.mulf %92, %94 : vector<2x8x1xf32>
    %cst_26 = arith.constant 2.000000e+00 : f32
    %96 = vector.broadcast %cst_26 : f32 to vector<2x8x1xf32>
    %97 = arith.subf %96, %95 : vector<2x8x1xf32>
    %98 = arith.mulf %94, %97 : vector<2x8x1xf32>
    %99 = vector.broadcast %98 : vector<2x8x1xf32> to vector<2x8x8xf32>
    %100 = arith.mulf %93, %99 : vector<2x8x8xf32>
    %101 = tpu.concatenate %34, %56, %78, %100 in 2 : vector<2x8x8xf32>, vector<2x8x8xf32>, vector<2x8x8xf32>, vector<2x8x8xf32> -> vector<2x8x32xf32>
    %102 = vector.shape_cast %101 : vector<2x8x32xf32> to vector<16x32xf32>
    %c0_27 = arith.constant 0 : index
    %c0_28 = arith.constant 0 : index
    %103 = vector.load %arg4[%c0_27, %c0_28] : memref<32x32xf32, #tpu.memory_space<vmem>>, vector<32x32xf32>
    %cst_29 = arith.constant dense<0.000000e+00> : vector<16x32xf32>
    %104 = tpu.matmul %102, %103, %cst_29 {dimension_numbers = #tpu.dot_dimension_numbers<[1], [0], [0], [1], [0, 0, 1, 1], [], []>} : vector<16x32xf32>, vector<32x32xf32>, vector<16x32xf32> -> vector<16x32xf32>
    %105 = vector.shape_cast %104 : vector<16x32xf32> to vector<2x8x32xf32>
    %c0_30 = arith.constant 0 : index
    %c0_31 = arith.constant 0 : index
    %c0_32 = arith.constant 0 : index
    %106 = vector.load %arg5[%c0_30, %c0_31, %c0_32] : memref<2x8x32xf32, #tpu.memory_space<vmem>>, vector<2x8x32xf32>
    tpu.vector_store %arg5[%c0_30, %c0_31, %c0_32], %105 {strides = array<i32>} : memref<2x8x32xf32, #tpu.memory_space<vmem>>, vector<2x8x32xf32>,
    return
  }
  func.func @transform_0(%arg0: i32) -> (i32, i32, i32) {
    %c0_i32 = arith.constant 0 : i32
    %c0_i32_0 = arith.constant 0 : i32
    %c0_i32_1 = arith.constant 0 : i32
    return %arg0, %c0_i32, %c0_i32_0 : i32, i32, i32
  }
  func.func @transform_1(%arg0: i32) -> (i32, i32, i32) {
    %c0_i32 = arith.constant 0 : i32
    %c0_i32_0 = arith.constant 0 : i32
    %c0_i32_1 = arith.constant 0 : i32
    return %arg0, %c0_i32, %c0_i32_0 : i32, i32, i32
  }
  func.func @transform_2(%arg0: i32) -> (i32, i32) {
    %c0_i32 = arith.constant 0 : i32
    %c0_i32_0 = arith.constant 0 : i32
    %c0_i32_1 = arith.constant 0 : i32
    return %c0_i32, %c0_i32_0 : i32, i32
  }
  func.func @transform_3(%arg0: i32) -> (i32, i32) {
    %c0_i32 = arith.constant 0 : i32
    %c0_i32_0 = arith.constant 0 : i32
    %c0_i32_1 = arith.constant 0 : i32
    return %c0_i32, %c0_i32_0 : i32, i32
  }
  func.func @transform_4(%arg0: i32) -> (i32, i32, i32) {
    %c0_i32 = arith.constant 0 : i32
    %c0_i32_0 = arith.constant 0 : i32
    %c0_i32_1 = arith.constant 0 : i32
    return %arg0, %c0_i32, %c0_i32_0 : i32, i32, i32
  }
}

</mosaic_0001>

<bundles_post_ra>
// kernel: tpu_custom_call.1
= control target key start
LH: loop header
LB: loop body
LE: loop exit
PB: predicated region body
PF: predicated region fallthrough
CT: control target
= control target key end

     0   :  { %9 = vsyncpa [#allocation3], 0  ;;  %s3730_s0 = inlined_call_operand.hbm [shape: f32[2,8,16], index: 0, kind: input, shape index: {}]   ;;  %s3731_s1 = inlined_call_operand.hbm [shape: f32[2,8,16], index: 1, kind: input, shape index: {}]   ;;  %s3732_s2 = inlined_call_operand.hbm [shape: f32[16,96], index: 2, kind: input, shape index: {}]   ;;  %s3733_s3 = inlined_call_operand.hbm [shape: f32[32,32], index: 3, kind: input, shape index: {}]   ;;  %s3734_s4 = inlined_call_operand.hbm [shape: f32[2,8,32], index: 4, kind: output, shape index: {}]  }
   0x1   :  { %10 = vsyncpa [#allocation6], 0 }
   0x2   :  { %11 = vsyncpa [#allocation9], 0 }
   0x3   :  { %12 = vsyncpa [#allocation4], 0  ;;  %s2830_s15 = smov [#allocation5]   ;;  %s2831_s17 = smov [#allocation2]  }
   0x4   :  { %s30_s16 = sshll.u32 %s2830_s15, 4  ;;  %s18_s18 = sshll.u32 %s2831_s17, 4  ;;  %s31_s16 = int_to_ptr.vmem [resolvable:$true] %s30_s16  ;;  %s19_s18 = int_to_ptr.vmem [resolvable:$true] %s18_s18 }
   0x5   :  { %s2730_s19 = scalar_lea.vmem %s31_s16, 256  ;;  %p2735_p1 = scmp.lt.s32.totalorder %s31_s16, %s31_s16 }
   0x6   :  { %p2731_p0 = scmp.ne.s32.totalorder %s31_s16, %s2730_s19  ;;  %p2736_p2 = scmp.lt.s32.totalorder %s2730_s19, %s2730_s19 }
   0x8   :  { %p2737_p3 = por %p2736_p2, %p2735_p1 }
   0xa   :  { %p2738_p4 = pnand %p2737_p3, %p2731_p0 }
   0xc   :  { %2741 = shalt.err (!%p2738_p4)
}
   0xd   :  { %s2832_s20 = smov 128   ;;  %s2833_s21 = smov 8  }
   0xe   :  { %36 = dma.hbm_to_vmem [thread:$0]  %s3731_s1, 256, %s31_s16, [#allocation6], %s2832_s20, %s2832_s20, %s2833_s21  }
   0xf   :  { %s2750_s24 = scalar_lea.vmem %s19_s18, 256  ;;  %p2755_p6 = scmp.lt.s32.totalorder %s19_s18, %s19_s18 }
  0x10   :  { %p2751_p5 = scmp.ne.s32.totalorder %s19_s18, %s2750_s24  ;;  %p2756_p7 = scmp.lt.s32.totalorder %s2750_s24, %s2750_s24 }
  0x12   :  { %p2757_p8 = por %p2756_p7, %p2755_p6 }
  0x14   :  { %p2758_p9 = pnand %p2757_p8, %p2751_p5 }
  0x16   :  { %2761 = shalt.err (!%p2758_p9)
}
  0x17   :  { %24 = dma.hbm_to_vmem [thread:$0]  %s3730_s0, 256, %s19_s18, [#allocation3], %s2832_s20, %s2832_s20, %s2833_s21  }
  0x18   :  { %s2834_s27 = smov [#allocation7]   ;;  %s2835_s29 = smov [#allocation8]  }
  0x19   :  { %s42_s28 = sshll.u32 %s2834_s27, 4  ;;  %s54_s30 = sshll.u32 %s2835_s29, 4  ;;  %s43_s28 = int_to_ptr.vmem [resolvable:$true] %s42_s28  ;;  %s55_s30 = int_to_ptr.vmem [resolvable:$true] %s54_s30 }
  0x1a   :  { %s2770_s1 = scalar_lea.vmem %s43_s28, 256  ;;  %p2775_p11 = scmp.lt.s32.totalorder %s43_s28, %s43_s28 }
  0x1b   :  { %p2771_p10 = scmp.ne.s32.totalorder %s43_s28, %s2770_s1  ;;  %p2776_p12 = scmp.lt.s32.totalorder %s2770_s1, %s2770_s1 }
  0x1d   :  { %p2777_p13 = por %p2776_p12, %p2775_p11 }
  0x1f   :  { %p2778_p0 = pnand %p2777_p13, %p2771_p10 }
  0x21   :  { %2781 = shalt.err (!%p2778_p0)
}
  0x22   :  { %48 = dma.hbm_to_vmem [thread:$0]  %s3732_s2, 256, %s43_s28, [#allocation6], %s2832_s20, %s2832_s20, %s2833_s21  }
  0x23   :  { %s2790_s0 = scalar_lea.vmem %s55_s30, 512  ;;  %p2795_p2 = scmp.lt.s32.totalorder %s55_s30, %s55_s30 }
  0x24   :  { %p2791_p1 = scmp.ne.s32.totalorder %s55_s30, %s2790_s0  ;;  %p2796_p3 = scmp.lt.s32.totalorder %s2790_s0, %s2790_s0 }
  0x26   :  { %p2797_p4 = por %p2796_p3, %p2795_p2 }
  0x28   :  { %p2798_p5 = pnand %p2797_p4, %p2791_p1 }
  0x2a   :  { %2801 = shalt.err (!%p2798_p5)
}
  0x2b   :  { %60 = dma.hbm_to_vmem [thread:$0]  %s3733_s3, 512, %s55_s30, [#allocation9], %s2832_s20, %s2832_s20, %s2833_s21  }
  0x2c   :  { %2822 = dma.done.wait [#allocation3], 256  }
  0x2d   :  { %2823 = vsyncadd [#allocation3], 4294967040 }
  0x2e   :  { %2824 = dma.done.wait [#allocation6], 512  }
  0x2f   :  { %2825 = vsyncadd [#allocation6], 4294966784 }
  0x30   :  { %2826 = dma.done.wait [#allocation9], 512  }
  0x31   :  { %2827 = vsyncadd [#allocation9], 4294966784  ;;  %vm79_vm0 = vcmask 130048   ;;  %v78_v0 = vld [vmem:[#allocation7 + $0x8] sm:$0xff]  ;;  %v77_v1 = vld [vmem:[#allocation7] sm:$0xff]  ;;  %s2836_s2 = smov 120   ;;  %v202_v20 = vlaneseq }
  0x32   :  { %v75_v2 = vld [vmem:[#allocation5] sm:$0xff]  ;;  %2668 = vmatprep.subr.mxu1 %v78_v0  ;;  %v76_v3 = vld [vmem:[#allocation5 + $0x8] sm:$0xff]  ;;  %2567 = vmatprep.subr.mxu0 %v78_v0  ;;  %v73_v4 = vld [vmem:[#allocation2] sm:$0xff]  ;;  %s2837_s3 = smov 104   ;;  %s2838_s9 = smov 112   ;;  %v3735_v8 = vmov 0.0  }
  0x33   :  { %2574 = vmatprep.mubr.msk.f32.mxu1 %vm79_vm0, %v75_v2  ;;  %2670 = vmatpush3.msra.mxu1 %v78_v0  ;;  %v74_v5 = vld [vmem:[#allocation2 + $0x8] sm:$0xff]  ;;  %s2840_s10 = smov 96   ;;  %v2841_v18 = vmov 1983009808   ;;  %v2842_v22 = vmov 1934713408  }
  0x34   :  { %2669 = vmatprep.subr.mxu1 %v77_v1  ;;  %2568 = vmatpush3.msra.mxu0 %v78_v0  ;;  %v200_v19 = vunpack.c.l.s4 %v2841_v18  ;;  %v232_v23 = vunpack.c.l.s4 %v2842_v22  ;;  %v203_v25 = vshrl.u32 %v202_v20, 7  ;;  %s2843_s11 = smov 64   ;;  %vm676_vm1 = vcmask 1041409   ;;  %s2845_s12 = smov 16  }
  0x35   :  { %2671 = vmatpush3.msra.mxu1 %v77_v1  ;;  %2569 = vmatprep.subr.mxu0 %v77_v1  ;;  %vm679_vm2 = vcmask 1042434   ;;  %vm682_vm3 = vcmask 1043459   ;;  %vm2844_vm4 = vmmov 0   ;;  %vm685_vm5 = vcmask 1044484   ;;  %s2846_s13 = smov 24   ;;  %s2847_s14 = smov [#allocation10]  }
  0x36   :  { %2575 = vmatmul.mubr.msk.f32.vlgmr.msra.gmra.mxu1 %vm79_vm0, %v76_v3  ;;  %2570 = vmatpush3.msra.mxu0 %v77_v1  ;;  %v201_v24 = vunpack.c.0.s8 %v200_v19  ;;  %v233_v28 = vunpack.c.0.s8 %v232_v23  ;;  %vm688_vm6 = vcmask 1045509   ;;  %vm691_vm7 = vcmask 1046534   ;;  %s2479_s15 = sshll.u32 %s2847_s14, 4  ;;  %s2480_s15 = int_to_ptr.vmem [resolvable:$true] %s2479_s15 }
  0x37   :  { %2571 = vmatprep.mubr.msk.f32.mxu0 %vm79_vm0, %v73_v4  ;;  %2577 = vmatprep.subr.mxu1 %v3735_v8  ;;  %vm694_vm8 = vcmask 1047559   ;;  %vm718_vm9 = vcmask 64512   ;;  %vm2383_vm10 = vcmask 195584   ;;  %vm2390_vm11 = vcmask 261120   ;;  %s2802_s16 = scalar_lea.vmem %s2480_s15, 256  ;;  %p2807_p7 = scmp.lt.s32.totalorder %s2480_s15, %s2480_s15 }
  0x38   :  { %2572 = vmatmul.mubr.msk.f32.vlgmr.msra.gmra.mxu0 %vm79_vm0, %v74_v5  ;;  %2587 = vmatprep.subr.mxu0 %v3735_v8  ;;  %v2930_v29 = vsub.s32 %v201_v24, %v203_v25  ;;  %v2935_v35 = vsub.s32 %v233_v28, %v203_v25  ;;  %p2803_p6 = scmp.ne.s32.totalorder %s2480_s15, %s2802_s16  ;;  %p2808_p8 = scmp.lt.s32.totalorder %s2802_s16, %s2802_s16 }
  0x39   :  { %2579 = vmatprep.mubr.msk.f32.mxu1 %vm2844_vm4, %v3735_v8  ;;  %2589 = vmatprep.mubr.msk.f32.mxu0 %vm2844_vm4, %v3735_v8 }
  0x3a   :  { %p2809_p9 = por %p2808_p8, %p2807_p7 }
  0x3c   :  { %p2810_p10 = pnand %p2809_p9, %p2803_p6 }
  0xf6   :  { %v2576_v6 = vpop.f32.mrf.mxu1 }
  0xf7   :  { %337 = vrot.lane.b32.xlu1 %v2576_v6, %s2836_s2 }
  0xf8   :  { %v168_v7 = vpop.f32.mrf.mxu1  ;;  %v2908_v9 = vpop.f32.mrf.mxu0 }
  0xf9   :  { %335 = vrot.lane.b32.xlu0 %v168_v7, %s2836_s2 }
  0xfa   :  { %v158_v10 = vpop.f32.mrf.mxu0 }
  0xfb   :  { %343 = vrot.lane.b32.xlu1 %v168_v7, %s2837_s3 }
  0xfd   :  { %339 = vrot.lane.b32.xlu0 %v168_v7, %s2838_s9 }
  0xff   :  { %345 = vrot.lane.b32.xlu1 %v2576_v6, %s2837_s3 }
 0x101   :  { %341 = vrot.lane.b32.xlu0 %v2576_v6, %s2838_s9 }
 0x103   :  { %349 = vrot.lane.b32.xlu1 %v2576_v6, %s2840_s10 }
 0x105   :  { %347 = vrot.lane.b32.xlu0 %v168_v7, %s2840_s10 }
 0x107   :  { %185 = vrot.lane.b32.xlu1 %v158_v10, %s2838_s9 }
 0x109   :  { %179 = vrot.lane.b32.xlu0 %v158_v10, %s2836_s2 }
 0x10d   :  { %191 = vrot.lane.b32.xlu0 %v158_v10, %s2837_s3 }
 0x169   :  { %v338_v11 = vpop.permute.xlu1 %337 }
 0x16a   :  { %353 = vrot.lane.b32.xlu0 %v338_v11, %s2840_s10 }
 0x16b   :  { %v336_v12 = vpop.permute.xlu0 %335 }
 0x16d   :  { %v2914_v13 = vpop.permute.xlu1 %343 }
 0x16f   :  { %v340_v14 = vpop.permute.xlu0 %339 }
 0x170   :  { %355 = vrot.lane.b32.xlu0 %v340_v14, %s2840_s10 }
 0x171   :  { %v2916_v15 = vpop.permute.xlu1 %345 }
 0x173   :  { %v2918_v16 = vpop.permute.xlu0 %341 }
 0x174   :  { %357 = vrot.lane.b32.xlu1 %v2918_v16, %s2840_s10  ;;  %361 = vrot.lane.b32.xlu0 %v2916_v15, %s2840_s10 }
 0x175   :  { %v2922_v17 = vpop.permute.xlu1 %349 }
 0x177   :  { %v2924_v21 = vpop.permute.xlu0 %347 }
 0x178   :  { %351 = vrot.lane.b32.xlu1 %v336_v12, %s2840_s10  ;;  %187 = vrot.lane.b32.xlu0 %v2908_v9, %s2838_s9 }
 0x179   :  { %v186_v26 = vpop.permute.xlu1 %185 }
 0x17a   :  { %v197_v30 = vcombine.low %v158_v10, %v186_v26  ;;  %v198_v31 = vcombine.high %v158_v10, %v186_v26 }
 0x17b   :  { %v180_v27 = vpop.permute.xlu0 %179 }
 0x17c   :  { %359 = vrot.lane.b32.xlu1 %v2914_v13, %s2840_s10  ;;  %507 = vrot.lane.b32.xlu0 %v168_v7, %s2843_s11  ;;  %v205_v36 = vrot.slane %v197_v30, %v2930_v29  ;;  %v212_v37 = vrot.slane %v198_v31, %v2930_v29 }
 0x17f   :  { %v192_v32 = vpop.permute.xlu0 %191 }
 0x180   :  { %v213_v33 = vcombine.low %v180_v27, %v192_v32  ;;  %v214_v34 = vcombine.high %v180_v27, %v192_v32  ;;  %181 = vrot.lane.b32.xlu1 %v2908_v9, %s2836_s2  ;;  %509 = vrot.lane.b32.xlu0 %v2576_v6, %s2843_s11 }
 0x182   :  { %v221_v38 = vrot.slane %v213_v33, %v2930_v29  ;;  %v228_v39 = vrot.slane %v214_v34, %v2930_v29 }
 0x184   :  { %v229_v40 = vcombine.low %v205_v36, %v221_v38  ;;  %v230_v41 = vcombine.high %v205_v36, %v221_v38  ;;  %v245_v42 = vcombine.low %v212_v37, %v228_v39  ;;  %v246_v43 = vcombine.high %v212_v37, %v228_v39  ;;  %193 = vrot.lane.b32.xlu1 %v2908_v9, %s2837_s3 }
 0x185   :  { %515 = vrot.lane.b32.xlu0 %v340_v14, %s2843_s11 }
 0x186   :  { %v2945_v44 = vrot.slane %v229_v40, %v2935_v35  ;;  %v2948_v45 = vrot.slane %v230_v41, %v2935_v35  ;;  %v2951_v46 = vrot.slane %v245_v42, %v2935_v35  ;;  %v2954_v47 = vrot.slane %v246_v43, %v2935_v35 }
 0x188   :  { %v261_v48 = vcombine.high %v2945_v44, %v3735_v8  ;;  %v2960_v49 = vcombine.high %v2948_v45, %v3735_v8  ;;  %513 = vrot.lane.b32.xlu1 %v338_v11, %s2843_s11  ;;  %v1131_v50 = vrot.slane %v2945_v44, 1  ;;  %v1133_v51 = vrot.slane %v2948_v45, 7 }
 0x189   :  { %v2967_v52 = vcombine.high %v2951_v46, %v3735_v8  ;;  %v2976_v53 = vcombine.high %v2954_v47, %v3735_v8  ;;  %v1137_v57 = vrot.slane %v2951_v46, 5  ;;  %v1539_v60 = vrot.slane %v2945_v44, 2 }
 0x18a   :  { %v1132_v54 = vsel %vm676_vm1, %v261_v48, %v1131_v50  ;;  %v1135_v55 = vrot.slane %v2960_v49, 6  ;;  %v1141_v62 = vrot.slane %v2954_v47, 3  ;;  %v1540_v63 = vrot.slane %v261_v48, 1 }
 0x18b   :  { %v1134_v56 = vsel %vm679_vm2, %v1133_v51, %v1132_v54  ;;  %v1139_v59 = vrot.slane %v2967_v52, 4  ;;  %v1143_v1 = vrot.slane %v2976_v53, 2  ;;  %v1543_v4 = vrot.slane %v2960_v49, 7 }
 0x18c   :  { %511 = vrot.lane.b32.xlu1 %v336_v12, %s2843_s11  ;;  %v1136_v58 = vsel %vm682_vm3, %v1135_v55, %v1134_v56  ;;  %v1541_v3 = vsel %vm676_vm1, %v1540_v63, %v1539_v60  ;;  %v1545_v7 = vrot.slane %v2951_v46, 6  ;;  %v1947_v10 = vrot.slane %v2945_v44, 3 }
 0x18d   :  { %v1138_v61 = vsel %vm685_vm5, %v1137_v57, %v1136_v58  ;;  %v1542_v6 = vsel %vm679_vm2, %v2948_v45, %v1541_v3  ;;  %v1547_v12 = vrot.slane %v2967_v52, 5  ;;  %v1950_v14 = vrot.slane %v2948_v45, 1 }
 0x18e   :  { %v1140_v0 = vsel %vm688_vm6, %v1139_v59, %v1138_v61  ;;  %v1544_v11 = vsel %vm682_vm3, %v1543_v4, %v1542_v6  ;;  %v1549_v19 = vrot.slane %v2954_v47, 4  ;;  %v1551_v22 = vrot.slane %v2976_v53, 3 }
 0x18f   :  { %v1142_v2 = vsel %vm691_vm7, %v1141_v62, %v1140_v0  ;;  %v1546_v18 = vsel %vm685_vm5, %v1545_v7, %v1544_v11  ;;  %v1953_v26 = vrot.slane %v2951_v46, 7  ;;  %v1955_v30 = vrot.slane %v2967_v52, 6 }
 0x190   :  { %519 = vrot.lane.b32.xlu1 %v2914_v13, %s2843_s11  ;;  %v2995_v5 = vsel %vm694_vm8, %v1143_v1, %v1142_v2  ;;  %v1948_v13 = vrot.slane %v261_v48, 2  ;;  %v1548_v20 = vsel %vm688_vm6, %v1547_v12, %v1546_v18  ;;  %v1957_v32 = vrot.slane %v2954_v47, 5 }
 0x191   :  { %v1550_v24 = vsel %vm691_vm7, %v1549_v19, %v1548_v20  ;;  %v1959_v34 = vrot.slane %v2976_v53, 4  ;;  %v675_v38 = vrot.slane %v261_v48, 7  ;;  %v678_v40 = vrot.slane %v2948_v45, 6 }
 0x192   :  { %v1949_v23 = vsel %vm676_vm1, %v1948_v13, %v1947_v10  ;;  %v3013_v27 = vsel %vm694_vm8, %v1551_v22, %v1550_v24  ;;  %v681_v43 = vrot.slane %v2960_v49, 5  ;;  %v684_v54 = vrot.slane %v2951_v46, 4 }
 0x193   :  { %v1951_v25 = vsel %vm679_vm2, %v1950_v14, %v1949_v23  ;;  %3737 = vst [vmem:[#allocation15_spill] sm:$0xff] %v3013_v27  ;;  %v677_v39 = vsel %vm676_vm1, %v675_v38, %v2945_v44  ;;  %v687_v48 = vrot.slane %v2967_v52, 3 }
 0x194   :  { %v1952_v28 = vsel %vm682_vm3, %v2960_v49, %v1951_v25  ;;  %v680_v42 = vsel %vm679_vm2, %v678_v40, %v677_v39 }
 0x195   :  { %v1954_v31 = vsel %vm685_vm5, %v1953_v26, %v1952_v28  ;;  %v683_v51 = vsel %vm682_vm3, %v681_v43, %v680_v42 }
 0x196   :  { %v1956_v33 = vsel %vm688_vm6, %v1955_v30, %v1954_v31  ;;  %v686_v55 = vsel %vm685_vm5, %v684_v54, %v683_v51 }
 0x197   :  { %v1958_v36 = vsel %vm691_vm7, %v1957_v32, %v1956_v33  ;;  %v689_v60 = vsel %vm688_vm6, %v687_v48, %v686_v55 }
 0x198   :  { %v3024_v37 = vsel %vm694_vm8, %v1959_v34, %v1958_v36 }
 0x199   :  { %3738 = vst [vmem:[#allocation16_spill] sm:$0xff] %v3024_v37 }
 0x1dc   :  { %v354_v41 = vpop.permute.xlu0 %353 }
 0x1e2   :  { %v356_v50 = vpop.permute.xlu0 %355 }
 0x1e3   :  { %v371_v63 = vcombine.low %v2924_v21, %v356_v50  ;;  %v372_v52 = vcombine.high %v2924_v21, %v356_v50 }
 0x1e5   :  { %v386_v20 = vrot.slane %v372_v52, %v2930_v29 }
 0x1e6   :  { %v358_v56 = vpop.permute.xlu1 %357  ;;  %v362_v57 = vpop.permute.xlu0 %361 }
 0x1e7   :  { %v439_v44 = vcombine.low %v2922_v17, %v358_v56  ;;  %v440_v45 = vcombine.high %v2922_v17, %v358_v56  ;;  %v455_v58 = vcombine.low %v354_v41, %v362_v57  ;;  %v456_v59 = vcombine.high %v354_v41, %v362_v57 }
 0x1e8   :  { %v690_v17 = vrot.slane %v2954_v47, 2  ;;  %v693_v47 = vrot.slane %v2976_v53, 1 }
 0x1e9   :  { %v447_v49 = vrot.slane %v439_v44, %v2930_v29  ;;  %v454_v61 = vrot.slane %v440_v45, %v2930_v29  ;;  %v463_v46 = vrot.slane %v455_v58, %v2930_v29  ;;  %v470_v62 = vrot.slane %v456_v59, %v2930_v29 }
 0x1ea   :  { %v352_v0 = vpop.permute.xlu1 %351  ;;  %v188_v1 = vpop.permute.xlu0 %187  ;;  %v692_v11 = vsel %vm691_vm7, %v690_v17, %v689_v60 }
 0x1eb   :  { %v471_v2 = vcombine.low %v447_v49, %v463_v46  ;;  %v472_v3 = vcombine.high %v447_v49, %v463_v46  ;;  %v487_v4 = vcombine.low %v454_v61, %v470_v62  ;;  %v488_v6 = vcombine.high %v454_v61, %v470_v62 }
 0x1ec   :  { %v265_v7 = vcombine.low %v2908_v9, %v188_v1  ;;  %v266_v10 = vcombine.high %v2908_v9, %v188_v1  ;;  %v379_v9 = vrot.slane %v371_v63, %v2930_v29  ;;  %v3070_v23 = vsel %vm694_vm8, %v693_v47, %v692_v11 }
 0x1ed   :  { %v3049_v12 = vrot.slane %v471_v2, %v2935_v35  ;;  %v3052_v13 = vrot.slane %v472_v3, %v2935_v35  ;;  %v3055_v21 = vrot.slane %v487_v4, %v2935_v35  ;;  %v3059_v14 = vrot.slane %v488_v6, %v2935_v35 }
 0x1ee   :  { %v360_v18 = vpop.permute.xlu1 %359  ;;  %v3061_v19 = vpop.permute.xlu0 %507  ;;  %v3078_v25 = vrot.slane %v265_v7, %v2930_v29  ;;  %v3081_v26 = vrot.slane %v266_v10, %v2930_v29 }
 0x1ef   :  { %v3067_v22 = vcombine.high %v3049_v12, %v3735_v8  ;;  %v3074_v53 = vcombine.high %v3052_v13, %v3735_v8  ;;  %v1247_v24 = vrot.slane %v3049_v12, 1  ;;  %v3085_v28 = vcombine.high %v3055_v21, %v3735_v8 }
 0x1f0   :  { %v825_v30 = vrot.slane %v3052_v13, 6  ;;  %v387_v31 = vcombine.low %v352_v0, %v360_v18  ;;  %v388_v32 = vcombine.high %v352_v0, %v360_v18  ;;  %v1249_v33 = vrot.slane %v3052_v13, 7 }
 0x1f1   :  { %v3094_v39 = vcombine.high %v3059_v14, %v3735_v8  ;;  %v823_v40 = vrot.slane %v3067_v22, 7  ;;  %v827_v54 = vrot.slane %v3074_v53, 5  ;;  %v829_v55 = vrot.slane %v3055_v21, 4 }
 0x1f2   :  { %v182_v36 = vpop.permute.xlu1 %181  ;;  %v3090_v38 = vpop.permute.xlu0 %509  ;;  %v395_v43 = vrot.slane %v387_v31, %v2930_v29  ;;  %v402_v50 = vrot.slane %v388_v32, %v2930_v29  ;;  %v1248_v56 = vsel %vm676_vm1, %v3067_v22, %v1247_v24  ;;  %v831_v59 = vrot.slane %v3085_v28, 3 }
 0x1f3   :  { %v824_v51 = vsel %vm676_vm1, %v823_v40, %v3049_v12  ;;  %v833_v60 = vrot.slane %v3059_v14, 2  ;;  %v835_v49 = vrot.slane %v3094_v39, 1  ;;  %v3111_v61 = vsel %vm679_vm2, %v1249_v33, %v1248_v56 }
 0x1f4   :  { %v403_v57 = vcombine.low %v379_v9, %v395_v43  ;;  %v404_v48 = vcombine.high %v379_v9, %v395_v43  ;;  %v419_v44 = vcombine.low %v386_v20, %v402_v50  ;;  %v420_v45 = vcombine.high %v386_v20, %v402_v50 }
 0x1f5   :  { %v826_v2 = vsel %vm679_vm2, %v825_v30, %v824_v51 }
 0x1f6   :  { %v194_v58 = vpop.permute.xlu1 %193  ;;  %v3114_v46 = vrot.slane %v403_v57, %v2935_v35  ;;  %v3117_v62 = vrot.slane %v404_v48, %v2935_v35  ;;  %v3120_v63 = vrot.slane %v419_v44, %v2935_v35  ;;  %v3126_v4 = vrot.slane %v420_v45, %v2935_v35 }
 0x1f7   :  { %v516_v52 = vpop.permute.xlu0 %515  ;;  %v281_v1 = vcombine.low %v182_v36, %v194_v58  ;;  %v282_v17 = vcombine.high %v182_v36, %v194_v58 }
 0x1f8   :  { %v3130_v6 = vcombine.high %v3114_v46, %v3735_v8  ;;  %v3136_v11 = vcombine.high %v3117_v62, %v3735_v8  ;;  %v3140_v47 = vcombine.high %v3120_v63, %v3735_v8  ;;  %v531_v18 = vcombine.low %v3061_v19, %v516_v52 }
 0x1f9   :  { %v532_v9 = vcombine.high %v3061_v19, %v516_v52  ;;  %v706_v24 = vrot.slane %v3117_v62, 6  ;;  %v1145_v30 = vrot.slane %v3114_v46, 1  ;;  %v289_v31 = vrot.slane %v281_v1, %v2930_v29 }
 0x1fa   :  { %v3144_v20 = vpop.permute.xlu1 %513  ;;  %v296_v32 = vrot.slane %v282_v17, %v2930_v29  ;;  %v1147_v33 = vrot.slane %v3117_v62, 7  ;;  %v704_v43 = vrot.slane %v3130_v6, 7  ;;  %v539_v48 = vrot.slane %v531_v18, %v2930_v29 }
 0x1fb   :  { %v297_v50 = vcombine.low %v3078_v25, %v289_v31  ;;  %v298_v51 = vcombine.high %v3078_v25, %v289_v31  ;;  %v3162_v45 = vcombine.high %v3126_v4, %v3735_v8  ;;  %v708_v18 = vrot.slane %v3136_v11, 5 }
 0x1fc   :  { %v313_v56 = vcombine.low %v3081_v26, %v296_v32  ;;  %v314_v57 = vcombine.high %v3081_v26, %v296_v32  ;;  %v705_v58 = vsel %vm676_vm1, %v704_v43, %v3114_v46  ;;  %v546_v26 = vrot.slane %v532_v9, %v2930_v29 }
 0x1fd   :  { %v3167_v52 = vrot.slane %v297_v50, %v2935_v35  ;;  %v3170_v25 = vrot.slane %v298_v51, %v2935_v35  ;;  %v707_v17 = vsel %vm679_vm2, %v706_v24, %v705_v58  ;;  %v710_v31 = vrot.slane %v3120_v63, 4 }
 0x1fe   :  { %v512_v44 = vpop.permute.xlu1 %511  ;;  %v3173_v1 = vrot.slane %v313_v56, %v2935_v35  ;;  %v3181_v32 = vsel %vm676_vm1, %v3130_v6, %v1145_v30  ;;  %v712_v50 = vrot.slane %v3140_v47, 3  ;;  %v714_v51 = vrot.slane %v3126_v4, 2 }
 0x1ff   :  { %v3185_v43 = vcombine.high %v3167_v52, %v3735_v8  ;;  %v828_v9 = vsel %vm682_vm3, %v827_v54, %v826_v2  ;;  %v3191_v24 = vrot.slane %v314_v57, %v2935_v35  ;;  %v3195_v56 = vcombine.high %v3170_v25, %v3735_v8 }
 0x200   :  { %v3199_v30 = vcombine.high %v3173_v1, %v3735_v8  ;;  %v716_v42 = vrot.slane %v3162_v45, 1  ;;  %v803_v41 = vrot.slane %v3170_v25, 6  ;;  %v709_v54 = vsel %vm682_vm3, %v708_v18, %v707_v17 }
 0x201   :  { %v711_v57 = vsel %vm685_vm5, %v710_v31, %v709_v54  ;;  %v830_v34 = vsel %vm685_vm5, %v829_v55, %v828_v9  ;;  %v801_v36 = vrot.slane %v3185_v43, 7  ;;  %v1157_v17 = vrot.slane %v3162_v45, 2 }
 0x202   :  { %v520_v58 = vpop.permute.xlu1 %519  ;;  %v713_v3 = vsel %vm688_vm6, %v712_v50, %v711_v57 }
 0x203   :  { %v547_v19 = vcombine.low %v512_v44, %v520_v58  ;;  %v548_v40 = vcombine.high %v512_v44, %v520_v58  ;;  %v832_v44 = vsel %vm688_vm6, %v831_v59, %v830_v34  ;;  %v715_v18 = vsel %vm691_vm7, %v714_v51, %v713_v3 }
 0x204   :  { %v834_v55 = vsel %vm691_vm7, %v833_v60, %v832_v44  ;;  %v802_v31 = vsel %vm676_vm1, %v801_v36, %v3167_v52  ;;  %v717_v50 = vsel %vm694_vm8, %v716_v42, %v715_v18  ;;  %v3226_v34 = vcombine.high %v3191_v24, %v3735_v8 }
 0x205   :  { %v555_v10 = vrot.slane %v547_v19, %v2930_v29  ;;  %v562_v7 = vrot.slane %v548_v40, %v2930_v29  ;;  %v804_v59 = vsel %vm679_vm2, %v803_v41, %v802_v31  ;;  %v805_v3 = vrot.slane %v3195_v56, 5  ;;  %2578 = vmatpush3.xpose.msk.msra.mxu1 %vm718_vm9, %v717_v50 }
 0x206   :  { %2582 = vmatprep.subr.mxu1 %v3735_v8  ;;  %v836_v41 = vsel %vm694_vm8, %v835_v49, %v834_v55  ;;  %v807_v36 = vrot.slane %v3173_v1, 4  ;;  %v811_v49 = vrot.slane %v3191_v24, 2  ;;  %v813_v55 = vrot.slane %v3226_v34, 1 }
 0x207   :  { %v563_v19 = vcombine.low %v539_v48, %v555_v10  ;;  %v564_v9 = vcombine.high %v539_v48, %v555_v10  ;;  %v579_v40 = vcombine.low %v546_v26, %v562_v7  ;;  %v580_v58 = vcombine.high %v546_v26, %v562_v7 }
 0x208   :  { %v806_v42 = vsel %vm682_vm3, %v805_v3, %v804_v59  ;;  %v809_v48 = vrot.slane %v3199_v30, 3  ;;  %2580 = vmatmul.mubr.msk.f32.vlgmr.msra.gmra.mxu1 %vm718_vm9, %v3070_v23 }
 0x209   :  { %v3231_v51 = vrot.slane %v563_v19, %v2935_v35  ;;  %v3234_v60 = vrot.slane %v564_v9, %v2935_v35  ;;  %v3237_v10 = vrot.slane %v579_v40, %v2935_v35  ;;  %v3240_v7 = vrot.slane %v580_v58, %v2935_v35  ;;  %2583 = vmatpush3.xpose.msk.msra.mxu1 %vm718_vm9, %v836_v41 }
 0x20a   :  { %v808_v18 = vsel %vm685_vm5, %v807_v36, %v806_v42  ;;  %2584 = vmatprep.mubr.msk.f32.mxu1 %vm2844_vm4, %v3735_v8  ;;  %2592 = vmatprep.subr.mxu1 %v3735_v8 }
 0x20b   :  { %v3252_v26 = vcombine.high %v3231_v51, %v3735_v8  ;;  %v3256_v54 = vcombine.high %v3234_v60, %v3735_v8  ;;  %v3260_v57 = vcombine.high %v3237_v10, %v3735_v8  ;;  %v1353_v44 = vrot.slane %v3231_v51, 1 }
 0x20c   :  { %v3270_v31 = vcombine.high %v3240_v7, %v3735_v8  ;;  %v810_v19 = vsel %vm688_vm6, %v809_v48, %v808_v18  ;;  %v939_v40 = vrot.slane %v3234_v60, 6  ;;  %v943_v50 = vrot.slane %v3237_v10, 4 }
 0x20d   :  { %v937_v9 = vrot.slane %v3252_v26, 7  ;;  %v941_v23 = vrot.slane %v3256_v54, 5  ;;  %v812_v58 = vsel %vm691_vm7, %v811_v49, %v810_v19  ;;  %v945_v59 = vrot.slane %v3260_v57, 3 }
 0x20e   :  { %v947_v3 = vrot.slane %v3240_v7, 2  ;;  %v814_v41 = vsel %vm694_vm8, %v813_v55, %v812_v58  ;;  %v949_v36 = vrot.slane %v3270_v31, 1  ;;  %v1148_v48 = vsel %vm679_vm2, %v1147_v33, %v3181_v32 }
 0x20f   :  { %v938_v42 = vsel %vm676_vm1, %v937_v9, %v3231_v51  ;;  %2585 = vmatmul.mubr.msk.f32.vlgmr.msra.gmra.mxu1 %vm718_vm9, %v814_v41  ;;  %v1149_v18 = vrot.slane %v3136_v11, 6  ;;  %v1151_v19 = vrot.slane %v3120_v63, 5  ;;  %v1153_v55 = vrot.slane %v3140_v47, 4 }
 0x210   :  { %v940_v49 = vsel %vm679_vm2, %v939_v40, %v938_v42  ;;  %v1155_v9 = vrot.slane %v3126_v4, 3  ;;  %v1354_v2 = vsel %vm676_vm1, %v3252_v26, %v1353_v44  ;;  %2594 = vmatprep.mubr.msk.f32.mxu1 %vm2844_vm4, %v3735_v8  ;;  %v1355_v40 = vrot.slane %v3234_v60, 7 }
 0x211   :  { %v942_v58 = vsel %vm682_vm3, %v941_v23, %v940_v49  ;;  %v1150_v32 = vsel %vm682_vm3, %v1149_v18, %v1148_v48  ;;  %v1357_v41 = vrot.slane %v3256_v54, 6  ;;  %v1359_v49 = vrot.slane %v3237_v10, 5 }
 0x212   :  { %v944_v33 = vsel %vm685_vm5, %v943_v50, %v942_v58  ;;  %v1152_v42 = vsel %vm685_vm5, %v1151_v19, %v1150_v32  ;;  %v1361_v0 = vrot.slane %v3260_v57, 4  ;;  %v1356_v50 = vsel %vm679_vm2, %v1355_v40, %v1354_v2 }
 0x213   :  { %v946_v23 = vsel %vm688_vm6, %v945_v59, %v944_v33  ;;  %v1154_v8 = vsel %vm688_vm6, %v1153_v55, %v1152_v42  ;;  %v1363_v48 = vrot.slane %v3240_v7, 3  ;;  %v1358_v59 = vsel %vm682_vm3, %v1357_v41, %v1356_v50 }
 0x214   :  { %v948_v44 = vsel %vm691_vm7, %v947_v3, %v946_v23  ;;  %v1156_v58 = vsel %vm691_vm7, %v1155_v9, %v1154_v8  ;;  %v1365_v19 = vrot.slane %v3270_v31, 2  ;;  %v1360_v3 = vsel %vm685_vm5, %v1359_v49, %v1358_v59 }
 0x215   :  { %v950_v18 = vsel %vm694_vm8, %v949_v36, %v948_v44  ;;  %v3321_v33 = vsel %vm694_vm8, %v1157_v17, %v1156_v58  ;;  %v3739_v55 = vrot.slane %v3074_v53, 6  ;;  %v1259_v32 = vrot.slane %v3094_v39, 2 }
 0x216   :  { %2588 = vmatpush3.msra.mxu0 %v950_v18  ;;  %v3740_v36 = vmov 0.0   ;;  %v1362_v8 = vsel %vm688_vm6, %v1361_v0, %v1360_v3  ;;  %v3741_v9 = vrot.slane %v3055_v21, 5  ;;  %v3742_v17 = vrot.slane %v3167_v52, 1 }
 0x217   :  { %v1252_v2 = vsel %vm682_vm3, %v3739_v55, %v3111_v61  ;;  %2597 = vmatprep.subr.mxu0 %v3740_v36  ;;  %v1237_v23 = vrot.slane %v3195_v56, 6  ;;  %v1364_v42 = vsel %vm691_vm7, %v1363_v48, %v1362_v8  ;;  %v3743_v61 = vrot.slane %v3085_v28, 4 }
 0x218   :  { %v1254_v40 = vsel %vm685_vm5, %v3741_v9, %v1252_v2  ;;  %v1234_v41 = vsel %vm676_vm1, %v3185_v43, %v3742_v17  ;;  %v3744_v44 = vrot.slane %v3170_v25, 7  ;;  %v1239_v50 = vrot.slane %v3173_v1, 5 }
 0x219   :  { %v1256_v49 = vsel %vm688_vm6, %v3743_v61, %v1254_v40  ;;  %v3348_v18 = vsel %vm694_vm8, %v1365_v19, %v1364_v42  ;;  %v3745_v58 = vrot.slane %v3059_v14, 3  ;;  %v1241_v48 = vrot.slane %v3199_v30, 4 }
 0x21a   :  { %v1236_v0 = vsel %vm679_vm2, %v3744_v44, %v1234_v41  ;;  %v1641_v55 = vrot.slane %v3167_v52, 2  ;;  %v1243_v9 = vrot.slane %v3191_v24, 3  ;;  %v1761_v19 = vrot.slane %v3231_v51, 2 }
 0x21b   :  { %v1258_v59 = vsel %vm691_vm7, %v3745_v58, %v1256_v49  ;;  %v1238_v3 = vsel %vm682_vm3, %v1237_v23, %v1236_v0  ;;  %v1245_v17 = vrot.slane %v3226_v34, 2  ;;  %v1554_v41 = vrot.slane %v3130_v6, 1 }
 0x21c   :  { %v3357_v2 = vsel %vm694_vm8, %v1259_v32, %v1258_v59  ;;  %v1240_v8 = vsel %vm685_vm5, %v1239_v50, %v1238_v3  ;;  %v1557_v42 = vrot.slane %v3136_v11, 7  ;;  %v1559_v61 = vrot.slane %v3120_v63, 6 }
 0x21d   :  { %3746 = vst [vmem:[#allocation17_spill] sm:$0xff] %v3357_v2  ;;  %v1242_v40 = vsel %vm688_vm6, %v1241_v48, %v1240_v8  ;;  %v1561_v32 = vrot.slane %v3140_v47, 5  ;;  %v3748_v44 = vrot.slane %v3114_v46, 2  ;;  %v1563_v50 = vrot.slane %v3126_v4, 4 }
 0x21e   :  { %v1244_v23 = vsel %vm691_vm7, %v1243_v9, %v1242_v40  ;;  %v1762_v58 = vrot.slane %v3252_v26, 1  ;;  %v1565_v3 = vrot.slane %v3162_v45, 3  ;;  %v1765_v48 = vrot.slane %v3256_v54, 7 }
 0x21f   :  { %v3370_v49 = vsel %vm694_vm8, %v1245_v17, %v1244_v23  ;;  %v1555_v0 = vsel %vm676_vm1, %v1554_v41, %v3748_v44  ;;  %v1767_v8 = vrot.slane %v3237_v10, 6  ;;  %v1769_v17 = vrot.slane %v3260_v57, 5 }
 0x220   :  { %3747 = vst [vmem:[#allocation18_spill] sm:$0xff] %v3370_v49  ;;  %v1556_v59 = vsel %vm679_vm2, %v3117_v62, %v1555_v0  ;;  %v1763_v40 = vsel %vm676_vm1, %v1762_v58, %v1761_v19  ;;  %v1656_v41 = vrot.slane %v3067_v22, 1  ;;  %v1771_v0 = vrot.slane %v3240_v7, 4 }
 0x221   :  { %v1558_v9 = vsel %vm682_vm3, %v1557_v42, %v1556_v59  ;;  %v1764_v44 = vsel %vm679_vm2, %v3234_v60, %v1763_v40  ;;  %v1773_v37 = vrot.slane %v3270_v31, 3  ;;  %v3749_v42 = vrot.slane %v3049_v12, 2 }
 0x222   :  { %v1560_v23 = vsel %vm685_vm5, %v1559_v61, %v1558_v9  ;;  %v1766_v49 = vsel %vm682_vm3, %v1765_v48, %v1764_v44  ;;  %v1659_v58 = vrot.slane %v3074_v53, 7  ;;  %v1661_v40 = vrot.slane %v3055_v21, 6 }
 0x223   :  { %v1562_v27 = vsel %vm688_vm6, %v1561_v32, %v1560_v23  ;;  %v1657_v19 = vsel %vm676_vm1, %v1656_v41, %v3749_v42  ;;  %v1768_v61 = vsel %vm685_vm5, %v1767_v8, %v1766_v49  ;;  %v1663_v41 = vrot.slane %v3085_v28, 5 }
 0x224   :  { %v1564_v59 = vsel %vm691_vm7, %v1563_v50, %v1562_v27  ;;  %v1658_v9 = vsel %vm679_vm2, %v3052_v13, %v1657_v19  ;;  %v1770_v32 = vsel %vm688_vm6, %v1769_v17, %v1768_v61  ;;  %v1665_v49 = vrot.slane %v3059_v14, 4 }
 0x225   :  { %v3403_v2 = vsel %vm694_vm8, %v1565_v3, %v1564_v59  ;;  %v1660_v48 = vsel %vm682_vm3, %v1659_v58, %v1658_v9  ;;  %v1772_v23 = vsel %vm691_vm7, %v1771_v0, %v1770_v32  ;;  %v1642_v50 = vrot.slane %v3185_v43, 1 }
 0x226   :  { %v1662_v27 = vsel %vm685_vm5, %v1661_v40, %v1660_v48  ;;  %v2169_v8 = vrot.slane %v3231_v51, 3  ;;  %v3414_v44 = vsel %vm694_vm8, %v1773_v37, %v1772_v23  ;;  %v1667_v17 = vrot.slane %v3094_v39, 3 }
 0x227   :  { %v1664_v3 = vsel %vm688_vm6, %v1663_v41, %v1662_v27  ;;  %v1643_v19 = vsel %vm676_vm1, %v1642_v50, %v1641_v55  ;;  %v1645_v0 = vrot.slane %v3195_v56, 7  ;;  %v1647_v58 = vrot.slane %v3173_v1, 6 }
 0x228   :  { %v1666_v42 = vsel %vm691_vm7, %v1665_v49, %v1664_v3  ;;  %v1644_v51 = vsel %vm679_vm2, %v3170_v25, %v1643_v19  ;;  %v1649_v37 = vrot.slane %v3199_v30, 5  ;;  %v1962_v61 = vrot.slane %v3130_v6, 2 }
 0x229   :  { %v3423_v59 = vsel %vm694_vm8, %v1667_v17, %v1666_v42  ;;  %v1646_v9 = vsel %vm682_vm3, %v1645_v0, %v1644_v51  ;;  %v1651_v40 = vrot.slane %v3191_v24, 4  ;;  %v1653_v55 = vrot.slane %v3226_v34, 3 }
 0x22a   :  { %v1967_v32 = vrot.slane %v3120_v63, 7  ;;  %v1648_v48 = vsel %vm685_vm5, %v1647_v58, %v1646_v9  ;;  %v3750_v41 = vrot.slane %v3114_v46, 3  ;;  %v1969_v27 = vrot.slane %v3140_v47, 6 }
 0x22b   :  { %v2170_v49 = vrot.slane %v3252_v26, 2  ;;  %v1650_v6 = vsel %vm688_vm6, %v1649_v37, %v1648_v48  ;;  %v3751_v50 = vrot.slane %v3117_v62, 1  ;;  %v1971_v17 = vrot.slane %v3126_v4, 5 }
 0x22c   :  { %v1963_v23 = vsel %vm676_vm1, %v1962_v61, %v3750_v41  ;;  %v2172_v63 = vrot.slane %v3234_v60, 1  ;;  %v1652_v42 = vsel %vm691_vm7, %v1651_v40, %v1650_v6  ;;  %v1973_v19 = vrot.slane %v3162_v45, 4 }
 0x22d   :  { %v1965_v3 = vsel %vm679_vm2, %v3751_v50, %v1963_v23  ;;  %v2171_v47 = vsel %vm676_vm1, %v2170_v49, %v2169_v8  ;;  %v3451_v26 = vsel %vm694_vm8, %v1653_v55, %v1652_v42  ;;  %v2175_v4 = vrot.slane %v3237_v10, 7 }
 0x22e   :  { %v1966_v46 = vsel %vm682_vm3, %v3136_v11, %v1965_v3  ;;  %v2173_v0 = vsel %vm679_vm2, %v2172_v63, %v2171_v47  ;;  %v2177_v11 = vrot.slane %v3260_v57, 6  ;;  %v2064_v45 = vrot.slane %v3067_v22, 2 }
 0x22f   :  { %v1968_v62 = vsel %vm685_vm5, %v1967_v32, %v1966_v46  ;;  %v2174_v58 = vsel %vm682_vm3, %v3256_v54, %v2173_v0  ;;  %v2049_v8 = vrot.slane %v3167_v52, 3  ;;  %v2179_v61 = vrot.slane %v3240_v7, 5 }
 0x230   :  { %v1970_v60 = vsel %vm688_vm6, %v1969_v27, %v1968_v62  ;;  %v2176_v37 = vsel %vm685_vm5, %v2175_v4, %v2174_v58  ;;  %v2181_v40 = vrot.slane %v3270_v31, 4  ;;  %v3752_v54 = vrot.slane %v3049_v12, 3 }
 0x231   :  { %v1972_v51 = vsel %vm691_vm7, %v1971_v17, %v1970_v60  ;;  %v2178_v10 = vsel %vm688_vm6, %v2177_v11, %v2176_v37  ;;  %v3753_v52 = vrot.slane %v3052_v13, 1  ;;  %v2069_v32 = vrot.slane %v3055_v21, 7 }
 0x232   :  { %v3466_v9 = vsel %vm694_vm8, %v1973_v19, %v1972_v51  ;;  %v2065_v57 = vsel %vm676_vm1, %v2064_v45, %v3752_v54  ;;  %v2180_v22 = vsel %vm691_vm7, %v2179_v61, %v2178_v10  ;;  %v2050_v7 = vrot.slane %v3185_v43, 2 }
 0x233   :  { %v2067_v55 = vsel %vm679_vm2, %v3753_v52, %v2065_v57  ;;  %v2052_v48 = vrot.slane %v3170_v25, 1  ;;  %v3481_v41 = vsel %vm694_vm8, %v2181_v40, %v2180_v22  ;;  %v2071_v31 = vrot.slane %v3085_v28, 6 }
 0x234   :  { %v2068_v12 = vsel %vm682_vm3, %v3074_v53, %v2067_v55  ;;  %v2073_v13 = vrot.slane %v3059_v14, 5  ;;  %v2051_v27 = vsel %vm676_vm1, %v2050_v7, %v2049_v8  ;;  %v2075_v43 = vrot.slane %v3094_v39, 4 }
 0x235   :  { %v2070_v23 = vsel %vm685_vm5, %v2069_v32, %v2068_v12  ;;  %v2053_v25 = vsel %vm679_vm2, %v2052_v48, %v2051_v27  ;;  %v2055_v49 = vrot.slane %v3173_v1, 7  ;;  %v2057_v28 = vrot.slane %v3199_v30, 6 }
 0x236   :  { %v2072_v21 = vsel %vm688_vm6, %v2071_v31, %v2070_v23  ;;  %v2054_v53 = vsel %vm682_vm3, %v3195_v56, %v2053_v25  ;;  %v2059_v3 = vrot.slane %v3191_v24, 5  ;;  %v2061_v17 = vrot.slane %v3226_v34, 4 }
 0x237   :  { %v2074_v6 = vsel %vm691_vm7, %v2073_v13, %v2072_v21  ;;  %v2056_v14 = vsel %vm685_vm5, %v2055_v49, %v2054_v53 }
 0x238   :  { %v3498_v50 = vsel %vm694_vm8, %v2075_v43, %v2074_v6  ;;  %v2058_v39 = vsel %vm688_vm6, %v2057_v28, %v2056_v14 }
 0x239   :  { %v2060_v1 = vsel %vm691_vm7, %v2059_v3, %v2058_v39 }
 0x23a   :  { %v3506_v63 = vsel %vm694_vm8, %v2061_v17, %v2060_v1 }
 0x2c8   :  { %v789_v42 = vpop.f32.mrf.mxu1 }
 0x2c9   :  { %v911_v56 = vsel %vm718_vm9, %v789_v42, -inf }
 0x2ca   :  { %912 = vmax.xlane.f32.xlu0 %v911_v56  ;;  %v2581_v30 = vpop.f32.mrf.mxu1 }
 0x2cf   :  { %v907_v46 = vpop.f32.mrf.mxu1 }
 0x2d0   :  { %v914_v19 = vsel %vm718_vm9, %v907_v46, -inf }
 0x2d1   :  { %915 = vmax.xlane.f32.xlu1 %v914_v19  ;;  %v2586_v47 = vpop.f32.mrf.mxu1 }
 0x2e0   :  { %517 = vrot.lane.b32.xlu0 %v2918_v16, %s2843_s11 }
 0x2e2   :  { %521 = vrot.lane.b32.xlu1 %v2916_v15, %s2843_s11 }
 0x353   :  { %v913_v24 = vpop.xlane.xlu0 %912 }
 0x354   :  { %v917_v34 = vsub.f32 %v789_v42, %v913_v24 }
 0x356   :  { %v919_v62 = vmul.f32 1.442695, %v917_v34 }
 0x357   :  { %v518_v0 = vpop.permute.xlu0 %517 }
 0x358   :  { %2690 = vpow2.f32 %v919_v62  ;;  %v599_v60 = vcombine.low %v3090_v38, %v518_v0  ;;  %v600_v58 = vcombine.high %v3090_v38, %v518_v0 }
 0x35a   :  { %v916_v4 = vpop.xlane.xlu1 %915  ;;  %v607_v15 = vrot.slane %v599_v60, %v2930_v29  ;;  %v614_v16 = vrot.slane %v600_v58, %v2930_v29 }
 0x35b   :  { %v918_v11 = vsub.f32 %v907_v46, %v916_v4 }
 0x35d   :  { %v921_v37 = vmul.f32 1.442695, %v918_v11 }
 0x35e   :  { %v522_v45 = vpop.permute.xlu1 %521 }
 0x35f   :  { %v615_v8 = vcombine.low %v3144_v20, %v522_v45  ;;  %v616_v51 = vcombine.high %v3144_v20, %v522_v45  ;;  %2692 = vpow2.f32 %v921_v37 }
 0x361   :  { %v623_v61 = vrot.slane %v615_v8, %v2930_v29  ;;  %v630_v10 = vrot.slane %v616_v51, %v2930_v29 }
 0x363   :  { %v631_v40 = vcombine.low %v607_v15, %v623_v61  ;;  %v632_v54 = vcombine.high %v607_v15, %v623_v61  ;;  %v647_v57 = vcombine.low %v614_v16, %v630_v10  ;;  %v648_v22 = vcombine.high %v614_v16, %v630_v10 }
 0x365   :  { %v3523_v38 = vrot.slane %v631_v40, %v2935_v35  ;;  %v3526_v52 = vrot.slane %v632_v54, %v2935_v35  ;;  %v3529_v20 = vrot.slane %v647_v57, %v2935_v35  ;;  %v3532_v55 = vrot.slane %v648_v22, %v2935_v35  ;;  %v3541_v48 = vpop.eup %2690  ;;  %v3754_v40 = vld [vmem:[#allocation17_spill] sm:$0xff] }
 0x366   :  { %2590 = vmatmul.mubr.msk.f32.vlgmr.msra.gmra.mxu0 %vm718_vm9, %v3541_v48 }
 0x367   :  { %v663_v29 = vcombine.high %v3523_v38, %v3740_v36  ;;  %v3538_v32 = vcombine.high %v3526_v52, %v3740_v36  ;;  %v1441_v7 = vrot.slane %v3523_v38, 1  ;;  %v3545_v12 = vcombine.high %v3529_v20, %v3740_v36  ;;  %2598 = vmatpush3.xpose.msk.msra.mxu0 %vm718_vm9, %v3321_v33  ;;  %2599 = vmatprep.mubr.msk.f32.mxu0 %vm2844_vm4, %v3740_v36 }
 0x368   :  { %v1849_v31 = vrot.slane %v3523_v38, 2  ;;  %v3556_v23 = vcombine.high %v3532_v55, %v3740_v36  ;;  %v1035_v13 = vrot.slane %v3526_v52, 6  ;;  %v1443_v21 = vrot.slane %v3526_v52, 7  ;;  %2607 = vmatprep.subr.mxu0 %v3740_v36 }
 0x369   :  { %v1033_v35 = vrot.slane %v663_v29, 7  ;;  %v1442_v27 = vsel %vm676_vm1, %v663_v29, %v1441_v7  ;;  %v2257_v43 = vrot.slane %v3523_v38, 3  ;;  %v1037_v25 = vrot.slane %v3538_v32, 5 }
 0x36a   :  { %v1445_v49 = vrot.slane %v3538_v32, 6  ;;  %v1039_v53 = vrot.slane %v3529_v20, 4  ;;  %v1444_v28 = vsel %vm679_vm2, %v1443_v21, %v1442_v27  ;;  %v1447_v14 = vrot.slane %v3529_v20, 5  ;;  %2600 = vmatmul.mubr.msk.f32.vlgmr.msra.gmra.mxu0 %vm718_vm9, %v2995_v5  ;;  %v3755_v27 = vld [vmem:[#allocation18_spill] sm:$0xff] }
 0x36b   :  { %v1034_v33 = vsel %vm676_vm1, %v1033_v35, %v3523_v38  ;;  %v1041_v39 = vrot.slane %v3545_v12, 3  ;;  %v1850_v1 = vrot.slane %v663_v29, 1  ;;  %2608 = vmatpush3.msra.mxu0 %v3348_v18  ;;  %v1043_v56 = vrot.slane %v3532_v55, 2  ;;  %2609 = vmatprep.mubr.msk.f32.mxu0 %vm2844_vm4, %v3740_v36 }
 0x36c   :  { %v1036_v6 = vsel %vm679_vm2, %v1035_v13, %v1034_v33  ;;  %v1446_v17 = vsel %vm682_vm3, %v1445_v49, %v1444_v28  ;;  %v1045_v30 = vrot.slane %v3556_v23, 1  ;;  %v1449_v19 = vrot.slane %v3545_v12, 4  ;;  %2617 = vmatprep.subr.mxu0 %v3740_v36  ;;  %v3596_v45 = vpop.eup %2692 }
 0x36d   :  { %v1038_v3 = vsel %vm682_vm3, %v1037_v25, %v1036_v6  ;;  %v1448_v46 = vsel %vm685_vm5, %v1447_v14, %v1446_v17  ;;  %v1851_v47 = vsel %vm676_vm1, %v1850_v1, %v1849_v31  ;;  %v1853_v18 = vrot.slane %v3538_v32, 7 }
 0x36e   :  { %v1040_v42 = vsel %vm685_vm5, %v1039_v53, %v1038_v3  ;;  %v1852_v34 = vsel %vm679_vm2, %v3526_v52, %v1851_v47  ;;  %v1855_v62 = vrot.slane %v3529_v20, 6  ;;  %v1857_v0 = vrot.slane %v3545_v12, 5 }
 0x36f   :  { %v1042_v5 = vsel %vm688_vm6, %v1041_v39, %v1040_v42  ;;  %v1450_v60 = vsel %vm688_vm6, %v1449_v19, %v1448_v46  ;;  %v1854_v58 = vsel %vm682_vm3, %v1853_v18, %v1852_v34  ;;  %v2258_v11 = vrot.slane %v663_v29, 2 }
 0x370   :  { %v1044_v24 = vsel %vm691_vm7, %v1043_v56, %v1042_v5  ;;  %v1451_v8 = vrot.slane %v3532_v55, 3  ;;  %v1856_v51 = vsel %vm685_vm5, %v1855_v62, %v1854_v58  ;;  %v1859_v15 = vrot.slane %v3532_v55, 4  ;;  %v3756_v5 = vld [vmem:[#allocation15_spill] sm:$0xff] }
 0x371   :  { %v1046_v4 = vsel %vm694_vm8, %v1045_v30, %v1044_v24  ;;  %v2260_v16 = vrot.slane %v3526_v52, 1  ;;  %v1858_v37 = vsel %vm688_vm6, %v1857_v0, %v1856_v51  ;;  %v1861_v61 = vrot.slane %v3556_v23, 3 }
 0x372   :  { %2593 = vmatpush3.msra.mxu1 %v1046_v4  ;;  %v2259_v10 = vsel %vm676_vm1, %v2258_v11, %v2257_v43  ;;  %v1452_v54 = vsel %vm691_vm7, %v1451_v8, %v1450_v60  ;;  %v1860_v57 = vsel %vm691_vm7, %v1859_v15, %v1858_v37  ;;  %v2263_v38 = vrot.slane %v3529_v20, 7 }
 0x373   :  { %2595 = vmatmul.mubr.msk.f32.vlgmr.msra.gmra.mxu1 %vm718_vm9, %v3596_v45  ;;  %2602 = vmatprep.subr.mxu1 %v3740_v36  ;;  %v2261_v22 = vsel %vm679_vm2, %v2260_v16, %v2259_v10  ;;  %v1453_v52 = vrot.slane %v3556_v23, 2  ;;  %v1862_v29 = vsel %vm694_vm8, %v1861_v61, %v1860_v57  ;;  %v2265_v31 = vrot.slane %v3545_v12, 6  ;;  %v3757_v16 = vld [vmem:[#allocation16_spill] sm:$0xff] }
 0x374   :  { %2603 = vmatpush3.xpose.msk.msra.mxu1 %vm718_vm9, %v3754_v40  ;;  %2604 = vmatprep.mubr.msk.f32.mxu1 %vm2844_vm4, %v3740_v36  ;;  %v2262_v7 = vsel %vm682_vm3, %v3538_v32, %v2261_v22  ;;  %v2267_v13 = vrot.slane %v3532_v55, 5  ;;  %v2269_v43 = vrot.slane %v3556_v23, 4 }
 0x375   :  { %2612 = vmatprep.subr.mxu1 %v3740_v36  ;;  %v2264_v35 = vsel %vm685_vm5, %v2263_v38, %v2262_v7  ;;  %v1454_v20 = vsel %vm694_vm8, %v1453_v52, %v1452_v54 }
 0x376   :  { %v2266_v21 = vsel %vm688_vm6, %v2265_v31, %v2264_v35 }
 0x377   :  { %2605 = vmatmul.mubr.msk.f32.vlgmr.msra.gmra.mxu1 %vm718_vm9, %v3755_v27  ;;  %v2268_v32 = vsel %vm691_vm7, %v2267_v13, %v2266_v21 }
 0x378   :  { %2613 = vmatpush3.msra.mxu1 %v1454_v20  ;;  %2614 = vmatprep.mubr.msk.f32.mxu1 %vm2844_vm4, %v3740_v36  ;;  %v3634_v12 = vsel %vm694_vm8, %v2269_v43, %v2268_v32 }
 0x379   :  { %2622 = vmatprep.subr.mxu1 %v3740_v36 }
 0x426   :  { %v3636_v55 = vpop.f32.mrf.mxu0 }
 0x428   :  { %v2591_v33 = vpop.f32.mrf.mxu0 }
 0x42a   :  { %v1229_v25 = vpop.f32.mrf.mxu0 }
 0x42b   :  { %v1335_v49 = vsel %vm718_vm9, %v1229_v25, -inf }
 0x42c   :  { %1336 = vmax.xlane.f32.xlu0 %v1335_v49  ;;  %v2601_v6 = vpop.f32.mrf.mxu0  ;;  %v923_v49 = vsel %vm718_vm9, %v3541_v48, 0.0 }
 0x433   :  { %v3639_v23 = vpop.f32.mrf.mxu1 }
 0x435   :  { %v2596_v53 = vpop.f32.mrf.mxu1 }
 0x437   :  { %v1331_v28 = vpop.f32.mrf.mxu1 }
 0x438   :  { %v1338_v14 = vsel %vm718_vm9, %v1331_v28, -inf }
 0x439   :  { %1339 = vmax.xlane.f32.xlu1 %v1338_v14  ;;  %v2606_v3 = vpop.f32.mrf.mxu1 }
 0x4b5   :  { %v1337_v39 = vpop.xlane.xlu0 %1336 }
 0x4b6   :  { %v1341_v17 = vsub.f32 %v1229_v25, %v1337_v39 }
 0x4b8   :  { %v1343_v1 = vmul.f32 1.442695, %v1341_v17 }
 0x4ba   :  { %2694 = vpow2.f32 %v1343_v1 }
 0x4c2   :  { %v1340_v42 = vpop.xlane.xlu1 %1339 }
 0x4c3   :  { %v1342_v56 = vsub.f32 %v1331_v28, %v1340_v42  ;;  %v926_v42 = vsel %vm718_vm9, %v3596_v45, 0.0 }
 0x4c5   :  { %v1345_v30 = vmul.f32 1.442695, %v1342_v56 }
 0x4c7   :  { %2696 = vpow2.f32 %v1345_v30  ;;  %v2695_v46 = vpop.eup %2694 }
 0x4c8   :  { %2610 = vmatmul.mubr.msk.f32.vlgmr.msra.gmra.mxu0 %vm718_vm9, %v2695_v46  ;;  %v1347_v40 = vsel %vm718_vm9, %v2695_v46, 0.0 }
 0x4c9   :  { %2618 = vmatpush3.xpose.msk.msra.mxu0 %vm718_vm9, %v3403_v2  ;;  %2619 = vmatprep.mubr.msk.f32.mxu0 %vm2844_vm4, %v3740_v36 }
 0x4ca   :  { %2627 = vmatprep.subr.mxu0 %v3740_v36 }
 0x4cc   :  { %2620 = vmatmul.mubr.msk.f32.vlgmr.msra.gmra.mxu0 %vm718_vm9, %v3756_v5 }
 0x4cd   :  { %2628 = vmatpush3.msra.mxu0 %v3414_v44  ;;  %2629 = vmatprep.mubr.msk.f32.mxu0 %vm2844_vm4, %v3740_v36 }
 0x4ce   :  { %2637 = vmatprep.subr.mxu0 %v3740_v36 }
 0x4d4   :  { %v2697_v19 = vpop.eup %2696 }
 0x4d5   :  { %2615 = vmatmul.mubr.msk.f32.vlgmr.msra.gmra.mxu1 %vm718_vm9, %v2697_v19  ;;  %v1350_v52 = vsel %vm718_vm9, %v2697_v19, 0.0 }
 0x4d6   :  { %2623 = vmatpush3.xpose.msk.msra.mxu1 %vm718_vm9, %v3423_v59  ;;  %2624 = vmatprep.mubr.msk.f32.mxu1 %vm2844_vm4, %v3740_v36 }
 0x4d7   :  { %2632 = vmatprep.subr.mxu1 %v3740_v36 }
 0x4d9   :  { %2625 = vmatmul.mubr.msk.f32.vlgmr.msra.gmra.mxu1 %vm718_vm9, %v3451_v26 }
 0x4da   :  { %2633 = vmatpush3.msra.mxu1 %v1862_v29  ;;  %2634 = vmatprep.mubr.msk.f32.mxu1 %vm2844_vm4, %v3740_v36 }
 0x4db   :  { %2642 = vmatprep.subr.mxu1 %v3740_v36 }
 0x588   :  { %v3665_v2 = vpop.f32.mrf.mxu0 }
 0x58a   :  { %v2611_v44 = vpop.f32.mrf.mxu0 }
 0x58c   :  { %v1637_v47 = vpop.f32.mrf.mxu0 }
 0x58d   :  { %v1743_v59 = vsel %vm718_vm9, %v1637_v47, -inf }
 0x58e   :  { %1744 = vmax.xlane.f32.xlu0 %v1743_v59  ;;  %v2621_v18 = vpop.f32.mrf.mxu0 }
 0x595   :  { %v3668_v24 = vpop.f32.mrf.mxu1 }
 0x597   :  { %v2616_v34 = vpop.f32.mrf.mxu1 }
 0x599   :  { %v1739_v62 = vpop.f32.mrf.mxu1 }
 0x59a   :  { %v1746_v26 = vsel %vm718_vm9, %v1739_v62, -inf }
 0x59b   :  { %v2626_v0 = vpop.f32.mrf.mxu1  ;;  %1747 = vmax.xlane.f32.xlu0 %v1746_v26 }
 0x617   :  { %v1745_v4 = vpop.xlane.xlu0 %1744 }
 0x618   :  { %v1749_v60 = vsub.f32 %v1637_v47, %v1745_v4 }
 0x61a   :  { %v1751_v58 = vmul.f32 1.442695, %v1749_v60 }
 0x61c   :  { %2698 = vpow2.f32 %v1751_v58  ;;  %v2389_v58 = vld [vmem:[#allocation8 + $0x18] sm:$0xff] }
 0x624   :  { %v1748_v11 = vpop.xlane.xlu0 %1747 }
 0x625   :  { %v1750_v8 = vsub.f32 %v1739_v62, %v1748_v11  ;;  %v2388_v11 = vld [vmem:[#allocation8 + $0x10] sm:$0xff] }
 0x627   :  { %v1753_v51 = vmul.f32 1.442695, %v1750_v8  ;;  %v2387_v8 = vld [vmem:[#allocation8 + $0x8] sm:$0xff] }
 0x629   :  { %2700 = vpow2.f32 %v1753_v51  ;;  %v2699_v15 = vpop.eup %2698 }
 0x62a   :  { %2630 = vmatmul.mubr.msk.f32.vlgmr.msra.gmra.mxu0 %vm718_vm9, %v2699_v15 }
 0x62b   :  { %2638 = vmatpush3.xpose.msk.msra.mxu0 %vm718_vm9, %v3466_v9  ;;  %2639 = vmatprep.mubr.msk.f32.mxu0 %vm2844_vm4, %v3740_v36 }
 0x62c   :  { %2647 = vmatprep.subr.mxu0 %v3740_v36 }
 0x62e   :  { %2640 = vmatmul.mubr.msk.f32.vlgmr.msra.gmra.mxu0 %vm718_vm9, %v3757_v16 }
 0x62f   :  { %2648 = vmatpush3.msra.mxu0 %v3481_v41  ;;  %2649 = vmatprep.mubr.msk.f32.mxu0 %vm2844_vm4, %v3740_v36 }
 0x630   :  { %2657 = vmatprep.subr.mxu0 %v2389_v58 }
 0x636   :  { %v2701_v37 = vpop.eup %2700 }
 0x637   :  { %2635 = vmatmul.mubr.msk.f32.vlgmr.msra.gmra.mxu1 %vm718_vm9, %v2701_v37  ;;  %v1758_v29 = vsel %vm718_vm9, %v2701_v37, 0.0 }
 0x638   :  { %2643 = vmatpush3.xpose.msk.msra.mxu1 %vm718_vm9, %v3498_v50  ;;  %2644 = vmatprep.mubr.msk.f32.mxu1 %vm2844_vm4, %v3740_v36 }
 0x639   :  { %2652 = vmatprep.subr.mxu1 %v3740_v36 }
 0x63b   :  { %2645 = vmatmul.mubr.msk.f32.vlgmr.msra.gmra.mxu1 %vm718_vm9, %v3506_v63  ;;  %v1755_v63 = vsel %vm718_vm9, %v2699_v15, 0.0  ;;  %v2386_v15 = vld [vmem:[#allocation8] sm:$0xff] }
 0x63c   :  { %2653 = vmatpush3.msra.mxu1 %v3634_v12  ;;  %2654 = vmatprep.mubr.msk.f32.mxu1 %vm2844_vm4, %v3740_v36 }
 0x6ea   :  { %v3693_v9 = vpop.f32.mrf.mxu0 }
 0x6ec   :  { %v2631_v41 = vpop.f32.mrf.mxu0 }
 0x6ee   :  { %v2045_v61 = vpop.f32.mrf.mxu0 }
 0x6ef   :  { %v2151_v10 = vsel %vm718_vm9, %v2045_v61, -inf }
 0x6f0   :  { %2152 = vmax.xlane.f32.xlu1 %v2151_v10  ;;  %v2641_v50 = vpop.f32.mrf.mxu0 }
 0x6f4   :  { %1348 = vadd.xlane.f32.xlu1 %v1347_v40 }
 0x6f7   :  { %v1933_v54 = vpop.f32.mrf.mxu1 }
 0x6f8   :  { %1756 = vadd.xlane.f32.xlu1 %v1755_v63 }
 0x6f9   :  { %v2636_v57 = vpop.f32.mrf.mxu1 }
 0x6fb   :  { %v2147_v22 = vpop.f32.mrf.mxu1 }
 0x6fc   :  { %v2154_v38 = vsel %vm718_vm9, %v2147_v22, -inf }
 0x6fd   :  { %2155 = vmax.xlane.f32.xlu0 %v2154_v38  ;;  %v2646_v36 = vpop.f32.mrf.mxu1 }
 0x701   :  { %1351 = vadd.xlane.f32.xlu0 %v1350_v52 }
 0x705   :  { %1759 = vadd.xlane.f32.xlu0 %v1758_v29 }
 0x779   :  { %v2153_v7 = vpop.xlane.xlu1 %2152 }
 0x77a   :  { %v2157_v31 = vsub.f32 %v2045_v61, %v2153_v7 }
 0x77c   :  { %v2159_v35 = vmul.f32 1.442695, %v2157_v31 }
 0x77d   :  { %v1349_v13 = vpop.xlane.xlu1 %1348 }
 0x77e   :  { %2702 = vpow2.f32 %v2159_v35 }
 0x77f   :  { %2704 = vrcp.f32 %v1349_v13 }
 0x781   :  { %v1757_v20 = vpop.xlane.xlu1 %1756 }
 0x782   :  { %2706 = vrcp.f32 %v1757_v20 }
 0x786   :  { %v2156_v27 = vpop.xlane.xlu0 %2155 }
 0x787   :  { %v2158_v21 = vsub.f32 %v2147_v22, %v2156_v27 }
 0x789   :  { %v2161_v43 = vmul.f32 1.442695, %v2158_v21 }
 0x78a   :  { %v1352_v32 = vpop.xlane.xlu0 %1351 }
 0x78b   :  { %2708 = vpow2.f32 %v2161_v43  ;;  %v2703_v12 = vpop.eup %2702 }
 0x78c   :  { %2650 = vmatmul.mubr.msk.f32.vlgmr.msra.gmra.mxu0 %vm718_vm9, %v2703_v12  ;;  %v2163_v25 = vsel %vm718_vm9, %v2703_v12, 0.0  ;;  %v2705_v6 = vpop.eup %2704 }
 0x78d   :  { %2164 = vadd.xlane.f32.xlu1 %v2163_v25  ;;  %v1531_v28 = vmul.f32 %v2705_v6, %v1349_v13  ;;  %2658 = vmatpush3.msra.mxu0 %v2389_v58 }
 0x78e   :  { %v1760_v33 = vpop.xlane.xlu0 %1759  ;;  %2659 = vmatprep.subr.mxu0 %v2388_v11 }
 0x78f   :  { %2710 = vrcp.f32 %v1760_v33  ;;  %v2707_v53 = vpop.eup %2706  ;;  %v1533_v39 = vsub.f32 2.0, %v1531_v28  ;;  %2660 = vmatpush3.msra.mxu0 %v2388_v11 }
 0x790   :  { %2712 = vrcp.f32 %v1352_v32  ;;  %v1939_v17 = vmul.f32 %v2707_v53, %v1757_v20  ;;  %2661 = vmatprep.subr.mxu0 %v2387_v8 }
 0x791   :  { %924 = vadd.xlane.f32.xlu1 %v923_v49  ;;  %v1535_v30 = vmul.f32 %v2705_v6, %v1533_v39  ;;  %2662 = vmatpush3.msra.mxu0 %v2387_v8 }
 0x792   :  { %v1941_v56 = vsub.f32 2.0, %v1939_v17  ;;  %2663 = vmatprep.subr.mxu0 %v2386_v15 }
 0x793   :  { %v1537_v44 = vmul.f32 %v1535_v30, %v3665_v2  ;;  %2664 = vmatpush3.msra.mxu0 %v2386_v15 }
 0x794   :  { %v1943_v5 = vmul.f32 %v2707_v53, %v1941_v56 }
 0x796   :  { %v1945_v18 = vmul.f32 %v1943_v5, %v3693_v9 }
 0x798   :  { %v2709_v14 = vpop.eup %2708 }
 0x799   :  { %2655 = vmatmul.mubr.msk.f32.vlgmr.msra.gmra.mxu1 %vm718_vm9, %v2709_v14  ;;  %v2166_v3 = vsel %vm718_vm9, %v2709_v14, 0.0 }
 0x79a   :  { %2167 = vadd.xlane.f32.xlu0 %v2166_v3 }
 0x79c   :  { %v2711_v1 = vpop.eup %2710 }
 0x79d   :  { %v1940_v48 = vmul.f32 %v2711_v1, %v1760_v33  ;;  %v2713_v46 = vpop.eup %2712 }
 0x79e   :  { %927 = vadd.xlane.f32.xlu0 %v926_v42  ;;  %v1532_v47 = vmul.f32 %v2713_v46, %v1352_v32 }
 0x79f   :  { %v1942_v19 = vsub.f32 2.0, %v1940_v48 }
 0x7a0   :  { %v1534_v34 = vsub.f32 2.0, %v1532_v47 }
 0x7a1   :  { %v1944_v59 = vmul.f32 %v2711_v1, %v1942_v19 }
 0x7a2   :  { %2357 = vrot.lane.b32.xlu1 %v1537_v44, %s2833_s21  ;;  %v1536_v45 = vmul.f32 %v2713_v46, %v1534_v34 }
 0x7a3   :  { %v1946_v62 = vmul.f32 %v1944_v59, %v1933_v54 }
 0x7a4   :  { %v1538_v26 = vmul.f32 %v1536_v45, %v3668_v24 }
 0x7a6   :  { %2365 = vrot.lane.b32.xlu1 %v1945_v18, %s2845_s12 }
 0x7aa   :  { %2367 = vrot.lane.b32.xlu1 %v1946_v62, %s2845_s12 }
 0x7b4   :  { %2359 = vrot.lane.b32.xlu0 %v1538_v26, %s2833_s21 }
 0x816   :  { %v2165_v0 = vpop.xlane.xlu1 %2164 }
 0x817   :  { %2714 = vrcp.f32 %v2165_v0 }
 0x81a   :  { %v925_v63 = vpop.xlane.xlu1 %924 }
 0x81e   :  { %v2358_v13 = vpop.permute.xlu1 %2357 }
 0x822   :  { %v2366_v43 = vpop.permute.xlu1 %2365 }
 0x823   :  { %v2168_v4 = vpop.xlane.xlu0 %2167 }
 0x824   :  { %2716 = vrcp.f32 %v2168_v4  ;;  %v2715_v2 = vpop.eup %2714 }
 0x825   :  { %v2347_v60 = vmul.f32 %v2715_v2, %v2165_v0  ;;  %2718 = vrcp.f32 %v925_v63 }
 0x826   :  { %v2368_v6 = vpop.permute.xlu1 %2367 }
 0x827   :  { %v2349_v51 = vsub.f32 2.0, %v2347_v60  ;;  %v928_v22 = vpop.xlane.xlu0 %927 }
 0x828   :  { %2720 = vrcp.f32 %v928_v22 }
 0x829   :  { %v2351_v16 = vmul.f32 %v2715_v2, %v2349_v51 }
 0x82b   :  { %v2360_v20 = vpop.permute.xlu0 %2359 }
 0x831   :  { %v2717_v24 = vpop.eup %2716 }
 0x832   :  { %v2348_v9 = vmul.f32 %v2717_v24, %v2168_v4  ;;  %v2719_v38 = vpop.eup %2718 }
 0x833   :  { %v1123_v36 = vmul.f32 %v2719_v38, %v925_v63 }
 0x834   :  { %v2350_v10 = vsub.f32 2.0, %v2348_v9 }
 0x835   :  { %v1125_v52 = vsub.f32 2.0, %v1123_v36  ;;  %v2721_v29 = vpop.eup %2720 }
 0x836   :  { %v2352_v50 = vmul.f32 %v2717_v24, %v2350_v10  ;;  %v1124_v31 = vmul.f32 %v2721_v29, %v928_v22 }
 0x837   :  { %v1127_v7 = vmul.f32 %v2719_v38, %v1125_v52 }
 0x838   :  { %v1126_v27 = vsub.f32 2.0, %v1124_v31 }
 0x839   :  { %v1129_v35 = vmul.f32 %v1127_v7, %v3636_v55 }
 0x83a   :  { %v1128_v32 = vmul.f32 %v2721_v29, %v1126_v27 }
 0x83b   :  { %v2379_v21 = vsel %vm718_vm9, %v1129_v35, %v2358_v13 }
 0x83c   :  { %v2381_v12 = vsel %vm79_vm0, %v2379_v21, %v2366_v43  ;;  %v1130_v49 = vmul.f32 %v1128_v32, %v3639_v23 }
 0x83e   :  { %v2380_v55 = vsel %vm718_vm9, %v1130_v49, %v2360_v20 }
 0x83f   :  { %v2382_v53 = vsel %vm79_vm0, %v2380_v55, %v2368_v6 }
 0x84c   :  { %v2253_v37 = vpop.f32.mrf.mxu0 }
 0x84d   :  { %v2353_v41 = vmul.f32 %v2351_v16, %v2253_v37 }
 0x84e   :  { %v2651_v61 = vpop.f32.mrf.mxu0 }
 0x84f   :  { %2373 = vrot.lane.b32.xlu0 %v2353_v41, %s2846_s13 }
 0x859   :  { %v2341_v40 = vpop.f32.mrf.mxu1 }
 0x85a   :  { %v2354_v54 = vmul.f32 %v2352_v50, %v2341_v40 }
 0x85b   :  { %v2656_v57 = vpop.f32.mrf.mxu1 }
 0x85c   :  { %2375 = vrot.lane.b32.xlu1 %v2354_v54, %s2846_s13 }
 0x8c1   :  { %v2374_v33 = vpop.permute.xlu0 %2373 }
 0x8c2   :  { %v2384_v25 = vsel %vm2383_vm10, %v2381_v12, %v2374_v33 }
 0x8c3   :  { %2665 = vmatprep.mubr.msk.f32.mxu0 %vm2390_vm11, %v2384_v25 }
 0x8ce   :  { %v2376_v28 = vpop.permute.xlu1 %2375 }
 0x8cf   :  { %v2385_v14 = vsel %vm2383_vm10, %v2382_v53, %v2376_v28 }
 0x8d0   :  { %2666 = vmatmul.mubr.msk.f32.vlgmr.msra.gmra.mxu0 %vm2390_vm11, %v2385_v14 }
 0x990   :  { %v2667_v3 = vpop.f32.mrf.mxu0 }
 0x991   :  { %2473 = vst.msk [vmem:[#allocation10 + $0x8] sm:$0xff] %vm2390_vm11, %v2667_v3 }
 0x992   :  { %v2463_v39 = vpop.f32.mrf.mxu0 }
 0x993   :  { %2472 = vst.msk [vmem:[#allocation10] sm:$0xff] %vm2390_vm11, %v2463_v39 }
 0x994   :  { %2813 = shalt.err (!%p2810_p10)
}
 0x995   :  { %2485 = dma.vmem_to_hbm [thread:$0]  %s2480_s15, 256, %s3734_s4, [#allocation4], %s2832_s20, %s2832_s20, %s2833_s21  }
 0x996   :  { %2828 = dma.done.wait [#allocation4], 256  }
 0x997   :  { %2829 = vsyncadd [#allocation4], 4294967040 }
 0x998   :  { %2489 = vsyncpa [#allocation3], 1 }
 0x999   :  { %2490 = vsyncpa [#allocation6], 1 }
 0x99a   :  { %2491 = vsyncpa [#allocation9], 1 }
 0x99b   :  { %2492 = vsyncpa [#allocation4], 1 }

</bundles_post_ra>
